<compile_context>
chip_gen: v7x
topology: tpu7x:2x2x1
jax: 0.10.0
libtpu: 0.0.40
codegen_flags: <defaults>
</compile_context>

<pallas_src>
import jax
import jax.numpy as jnp
from jax import lax
from jax.experimental import pallas as pl
from jax.experimental.pallas import tpu as pltpu

NUM_CLASSES = 4
IGNORE_INDEX = 255
UPPER_BOUND = 1.0
NORM = False

LANES = 128
SUB_ROWS = 128          # sublane rows per compute sub-chunk (bounds live temps)
MAX_S_TILE = 2048       # sublane rows per DMA block (4 MiB f32 x block at C=4)
USE_MXU_REDUCE = True   # offload sublane reductions to the (idle) MXU


def _round_up(x, m):
    return ((x + m - 1) // m) * m


def _sublane_quantum(dtype):
    # native sublane tiling: 8 for 32-bit, 16 for 16-bit, 32 for 8-bit dtypes
    return max(8, 32 // jnp.dtype(dtype).itemsize)


def _make_kernel(C, s_tile, sub, n_chunks, s_valid, mask_tail):
    """Builds the per-shape specialized kernel body."""

    def kernel(x_ref, t_ref, o_ref, acc_ref):
        # x_ref : (1, C, s_tile, 128)  logits block (f32 or bf16)
        # t_ref : (1, s_tile, 128)     labels block (any integer dtype)
        # o_ref : (1, 1, 128)          per-image loss, broadcast over lanes
        # acc_ref: (2*C, 128) f32      rows [0, C): per-class pixel counts
        #                              rows [C, 2C): per-class sum of logp@target
        k = pl.program_id(1)
        nk = pl.num_programs(1)

        @pl.when(k == 0)
        def _init():
            acc_ref[...] = jnp.zeros_like(acc_ref)

        # Hoisted loop invariants (JAX does not CSE broadcast_in_dim).
        if USE_MXU_REDUCE:
            ones_lhs = jnp.ones((8, sub), jnp.float32)
        if mask_tail:
            row_iota = lax.broadcasted_iota(jnp.int32, (sub, LANES), 0)
            block_row0 = k * s_tile

        def _reduce_rows(arr):
            # Sum a (sub, 128) f32 array over its sublane axis.
            if USE_MXU_REDUCE:
                # ones-row matmul moves the adds from the VALU slot to the MXU;
                # HIGHEST keeps f32 accuracy of the accumulated log-probs.
                return jnp.dot(ones_lhs, arr,
                               preferred_element_type=jnp.float32,
                               precision=jax.lax.Precision.HIGHEST)
            return jnp.sum(arr, axis=0, keepdims=True)

        def chunk(j, carry):
            base = pl.multiple_of(j * sub, sub)
            t = t_ref[0, pl.ds(base, sub), :]
            xs = [x_ref[0, c, pl.ds(base, sub), :].astype(jnp.float32)
                  for c in range(C)]

            # channel max and log-sum-exp via an unrolled elementwise loop
            m = xs[0]
            for c in range(1, C):
                m = jnp.maximum(m, xs[c])
            se = jnp.exp(xs[0] - m)
            for c in range(1, C):
                se = se + jnp.exp(xs[c] - m)
            g = m + jnp.log(se)                     # logp_c = xs[c] - g

            if mask_tail:
                # rows >= s_valid belong to the OOB part of the last partial
                # block and may contain garbage / NaN.
                valid = (row_iota + (block_row0 + base)) < s_valid

            new_h, new_a = [], []
            for c in range(C):
                mc = t == c
                if mask_tail:
                    mc = jnp.logical_and(mc, valid)
                # where-select (not multiply) so garbage/NaN rows cannot leak.
                new_h.append(carry[c] + _reduce_rows(mc.astype(jnp.float32)))
                new_a.append(carry[C + c]
                             + _reduce_rows(jnp.where(mc, xs[c] - g, 0.0)))
            return tuple(new_h) + tuple(new_a)

        rrows = 8 if USE_MXU_REDUCE else 1
        init = tuple(jnp.zeros((rrows, LANES), jnp.float32)
                     for _ in range(2 * C))
        carry = lax.fori_loop(0, n_chunks, chunk, init, unroll=True)

        for r in range(2 * C):
            row = pl.ds(r, 1)
            acc_ref[row, :] = acc_ref[row, :] + carry[r][0:1, :]

        @pl.when(k == nk - 1)
        def _finalize():
            sums = jnp.sum(acc_ref[...], axis=1, keepdims=True)   # (2C, 1)
            counts = sums[0:C, :]
            asums = sums[C:2 * C, :]
            # np.histogram(bins=range(C+1), density=True): counts / total.
            # Labels equal to C (numpy's closed right bin edge) are not
            # counted; they are invalid NLLLoss targets anyway.
            total = jnp.sum(counts)
            hist = counts / total
            nonzero = (hist != 0).astype(jnp.float32)
            if NORM:
                # TODO(synk): numpy's norm=True path yields NaN for empty
                # classes (0 * inf); a guarded reciprocal is used instead.
                w = (nonzero * UPPER_BOUND
                     * jnp.where(hist != 0, 1.0 / hist, 0.0) + 1.0)
            else:
                w = nonzero * UPPER_BOUND * (1.0 - hist) + 1.0     # (C, 1)
            num = -jnp.sum(w * asums)
            den = jnp.sum(w * counts)   # 0 (-> NaN) iff image is all-ignore
            o_ref[...] = jnp.broadcast_to(num / den, o_ref.shape).astype(
                o_ref.dtype)

    return kernel


def image_based_cross_entropy_loss_2d(inputs, targets):
    """inputs: (N, C, H, W) logits (f32 or bf16); targets: (N, H, W) int labels."""
    N, C, H, W = inputs.shape
    HW = H * W

    # Preserve caller dtypes: bf16 logits stay bf16 (upcast per sub-chunk in
    # the kernel) and narrow integer labels (e.g. uint8) stay narrow, cutting
    # HBM traffic on bandwidth-bound v5e/v6e without any wrapper-side copy.
    x = inputs if inputs.dtype == jnp.bfloat16 else inputs.astype(jnp.float32)
    t = (targets if jnp.issubdtype(targets.dtype, jnp.integer)
         else targets.astype(jnp.int32))

    quant = max(_sublane_quantum(x.dtype), _sublane_quantum(t.dtype))
    s_total = -(-HW // LANES)                      # 128-pixel rows
    s_pad = _round_up(max(s_total, 1), quant)      # rows actually laid out
    if s_pad <= SUB_ROWS:
        s_tile = s_pad                             # whole image in one block
    else:
        s_tile = min(MAX_S_TILE, SUB_ROWS * (s_pad // SUB_ROWS))
    sub = min(SUB_ROWS, s_tile)
    n_chunks = s_tile // sub
    num_k = -(-s_pad // s_tile)
    mask_tail = num_k * s_tile > s_pad             # last block reads OOB rows

    # Only the sub-128 / tiling remainder is padded (<= quant*128 pixels) and
    # it fuses with the unavoidable relayout; the ragged s_pad % s_tile tail is
    # masked in-kernel, so no full padded copy of the logits is materialized.
    # TODO(synk): a manual-DMA (memory_space=pl.ANY) path could avoid even this
    # small pad when HW % 128 != 0.
    hw_pad = s_pad * LANES
    x = x.reshape(N, C, HW)
    t = t.reshape(N, HW)
    if hw_pad != HW:
        x = jnp.pad(x, ((0, 0), (0, 0), (0, hw_pad - HW)))
        t = jnp.pad(t, ((0, 0), (0, hw_pad - HW)),
                    constant_values=IGNORE_INDEX)
    x = x.reshape(N, C, s_pad, LANES)
    t = t.reshape(N, s_pad, LANES)

    kernel = _make_kernel(C, s_tile, sub, n_chunks, s_pad, mask_tail)

    per_image = pl.pallas_call(
        kernel,
        out_shape=jax.ShapeDtypeStruct((N, 1, LANES), jnp.float32),
        grid_spec=pltpu.PrefetchScalarGridSpec(
            num_scalar_prefetch=0,
            grid=(N, num_k),
            in_specs=[
                pl.BlockSpec((1, C, s_tile, LANES), lambda i, k: (i, 0, k, 0)),
                pl.BlockSpec((1, s_tile, LANES), lambda i, k: (i, k, 0)),
            ],
            out_specs=pl.BlockSpec((1, 1, LANES), lambda i, k: (i, 0, 0)),
            scratch_shapes=[
                # rows [0,C): per-class counts, rows [C,2C): sum logp@target
                pltpu.VMEM((2 * C, LANES), jnp.float32),
            ],
        ),
        # TODO(synk): on v7x with N == 1, split the pixel axis across the two
        # TensorCores (leading core axis + tiny combine) instead of relying on
        # batch parallelism alone.
        compiler_params=pltpu.CompilerParams(
            dimension_semantics=("parallel", "arbitrary"),
            vmem_limit_bytes=32 * 1024 * 1024),
    )(x, t)
    return jnp.sum(per_image[:, 0, 0])


def _reference_loss(inputs, targets):
    """Pure-JAX reference mirroring the PyTorch module (norm=False)."""
    N, C, H, W = inputs.shape
    x_all = inputs.astype(jnp.float32).reshape(N, C, -1)
    t_all = targets.astype(jnp.int32).reshape(N, -1)
    total = jnp.float32(0.0)
    for i in range(N):
        x = x_all[i]
        tgt = t_all[i]
        onehot = (tgt[None, :] == jnp.arange(C)[:, None])
        counts = jnp.sum(onehot, axis=1).astype(jnp.float32)
        hist = counts / jnp.sum(counts)
        w = (hist != 0).astype(jnp.float32) * UPPER_BOUND * (1.0 - hist) + 1.0
        logp = jax.nn.log_softmax(x, axis=0)
        oh_f = onehot.astype(jnp.float32)
        logp_t = jnp.sum(oh_f * logp, axis=0)
        w_t = jnp.sum(oh_f * w[:, None], axis=0)
        total = total + (-jnp.sum(w_t * logp_t) / jnp.sum(w_t))
    return total


if __name__ == "__main__":
    N, C = 2, NUM_CLASSES

    def make_case(key, H, W, x_dtype=jnp.float32, t_dtype=jnp.int32):
        k1, k2, k3 = jax.random.split(key, 3)
        x = jax.random.normal(k1, (N, C, H, W), dtype=jnp.float32)
        t = jax.random.randint(k2, (N, H, W), 0, C, dtype=jnp.int32)
        ign = jax.random.uniform(k3, (N, H, W)) < 0.1
        t = jnp.where(ign, IGNORE_INDEX, t)
        return x.astype(x_dtype), t.astype(t_dtype)

    # Tolerance leaves headroom for MXU pass-based f32 emulation of the
    # ones-row reduction matmuls; everything else is plain f32.
    RTOL = ATOL = 1e-3

    # Case 1: small aligned-ish image, f32 logits / int32 labels.
    x1, t1 = make_case(jax.random.PRNGKey(0), 16, 16)
    loss1 = image_based_cross_entropy_loss_2d(x1, t1)
    jax.block_until_ready(loss1)
    ref1 = _reference_loss(x1, t1)
    assert jnp.allclose(loss1, ref1, rtol=RTOL, atol=ATOL), (loss1, ref1)

    # Case 2: HW % 128 != 0 AND s_pad % s_tile != 0 -> exercises the minimal
    # 128-pad path and the in-kernel masked partial grid block.
    x2, t2 = make_case(jax.random.PRNGKey(1), 129, 129)
    loss2 = image_based_cross_entropy_loss_2d(x2, t2)
    jax.block_until_ready(loss2)
    ref2 = _reference_loss(x2, t2)
    assert jnp.allclose(loss2, ref2, rtol=RTOL, atol=ATOL), (loss2, ref2)

    # Case 3: bf16 logits + uint8 labels (bandwidth path for v5e/v6e).
    x3, t3 = make_case(jax.random.PRNGKey(2), 16, 16,
                       x_dtype=jnp.bfloat16, t_dtype=jnp.uint8)
    loss3 = image_based_cross_entropy_loss_2d(x3, t3)
    jax.block_until_ready(loss3)
    ref3 = _reference_loss(x3, t3)
    assert jnp.allclose(loss3, ref3, rtol=RTOL, atol=ATOL), (loss3, ref3)

    print("KERNEL_OK")
</pallas_src>

<mosaic_0001>
module attributes {stable_mosaic.version = 11 : i64} {
  func.func @kernel(%arg0: i32, %arg1: i32, %arg2: memref<1x4x8x128xf32, #tpu.memory_space<vmem>>, %arg3: memref<1x8x128xi32, #tpu.memory_space<vmem>>, %arg4: memref<1x1x128xf32, #tpu.memory_space<vmem>>, %arg5: memref<8x128xf32, #tpu.memory_space<vmem>>) attributes {dimension_semantics = [#tpu.dimension_semantics<parallel>, #tpu.dimension_semantics<arbitrary>], iteration_bounds = array<i64: 2, 1>, scalar_prefetch = 0 : i64, scratch_operands = 1 : i64, tpu.core_type = #tpu.core_type<tc>, window_params = [{transform_indices = @transform_0, window_bounds = array<i64: 1, 4, 8, 128>}, {transform_indices = @transform_1, window_bounds = array<i64: 1, 8, 128>}, {transform_indices = @transform_2, window_bounds = array<i64: 1, 1, 128>}]} {
    %c0_i32 = arith.constant 0 : i32
    %0 = arith.cmpi eq, %arg1, %c0_i32 : i32
    %1 = arith.extui %0 : i1 to i32
    %c0_i32_0 = arith.constant 0 : i32
    %2 = arith.cmpi ne, %1, %c0_i32_0 : i32
    scf.if %2 {
      %cst_64 = arith.constant 0.000000e+00 : f32
      %124 = vector.broadcast %cst_64 : f32 to vector<8x128xf32>
      %c0_65 = arith.constant 0 : index
      %c0_66 = arith.constant 0 : index
      %125 = vector.load %arg5[%c0_65, %c0_66] : memref<8x128xf32, #tpu.memory_space<vmem>>, vector<8x128xf32>
      tpu.vector_store %arg5[%c0_65, %c0_66], %124 {strides = array<i32>} : memref<8x128xf32, #tpu.memory_space<vmem>>, vector<8x128xf32>,
    } else {
    }
    %cst = arith.constant 1.000000e+00 : f32
    %3 = vector.broadcast %cst : f32 to vector<8x8xf32>
    %cst_1 = arith.constant 0.000000e+00 : f32
    %4 = vector.broadcast %cst_1 : f32 to vector<8x128xf32>
    %cst_2 = arith.constant 0.000000e+00 : f32
    %5 = vector.broadcast %cst_2 : f32 to vector<8x128xf32>
    %cst_3 = arith.constant 0.000000e+00 : f32
    %6 = vector.broadcast %cst_3 : f32 to vector<8x128xf32>
    %cst_4 = arith.constant 0.000000e+00 : f32
    %7 = vector.broadcast %cst_4 : f32 to vector<8x128xf32>
    %cst_5 = arith.constant 0.000000e+00 : f32
    %8 = vector.broadcast %cst_5 : f32 to vector<8x128xf32>
    %cst_6 = arith.constant 0.000000e+00 : f32
    %9 = vector.broadcast %cst_6 : f32 to vector<8x128xf32>
    %cst_7 = arith.constant 0.000000e+00 : f32
    %10 = vector.broadcast %cst_7 : f32 to vector<8x128xf32>
    %cst_8 = arith.constant 0.000000e+00 : f32
    %11 = vector.broadcast %cst_8 : f32 to vector<8x128xf32>
    %c0_i32_9 = arith.constant 0 : i32
    %c8_i32 = arith.constant 8 : i32
    %12 = arith.muli %c0_i32_9, %c8_i32 : i32
    %13 = tpu.assume_multiple %12, 8 : i32
    %c0 = arith.constant 0 : index
    %14 = arith.index_cast %13 : i32 to index
    %c0_10 = arith.constant 0 : index
    %15 = vector.load %arg3[%c0, %14, %c0_10] : memref<1x8x128xi32, #tpu.memory_space<vmem>>, vector<1x8x128xi32>
    %16 = vector.shape_cast %15 : vector<1x8x128xi32> to vector<8x128xi32>
    %c0_11 = arith.constant 0 : index
    %c0_12 = arith.constant 0 : index
    %17 = arith.index_cast %13 : i32 to index
    %c0_13 = arith.constant 0 : index
    %18 = vector.load %arg2[%c0_11, %c0_12, %17, %c0_13] : memref<1x4x8x128xf32, #tpu.memory_space<vmem>>, vector<1x1x8x128xf32>
    %19 = vector.shape_cast %18 : vector<1x1x8x128xf32> to vector<8x128xf32>
    %c0_14 = arith.constant 0 : index
    %c1 = arith.constant 1 : index
    %20 = arith.index_cast %13 : i32 to index
    %c0_15 = arith.constant 0 : index
    %21 = vector.load %arg2[%c0_14, %c1, %20, %c0_15] : memref<1x4x8x128xf32, #tpu.memory_space<vmem>>, vector<1x1x8x128xf32>
    %22 = vector.shape_cast %21 : vector<1x1x8x128xf32> to vector<8x128xf32>
    %c0_16 = arith.constant 0 : index
    %c2 = arith.constant 2 : index
    %23 = arith.index_cast %13 : i32 to index
    %c0_17 = arith.constant 0 : index
    %24 = vector.load %arg2[%c0_16, %c2, %23, %c0_17] : memref<1x4x8x128xf32, #tpu.memory_space<vmem>>, vector<1x1x8x128xf32>
    %25 = vector.shape_cast %24 : vector<1x1x8x128xf32> to vector<8x128xf32>
    %c0_18 = arith.constant 0 : index
    %c3 = arith.constant 3 : index
    %26 = arith.index_cast %13 : i32 to index
    %c0_19 = arith.constant 0 : index
    %27 = vector.load %arg2[%c0_18, %c3, %26, %c0_19] : memref<1x4x8x128xf32, #tpu.memory_space<vmem>>, vector<1x1x8x128xf32>
    %28 = vector.shape_cast %27 : vector<1x1x8x128xf32> to vector<8x128xf32>
    %29 = arith.maximumf %19, %22 : vector<8x128xf32>
    %30 = arith.maximumf %29, %25 : vector<8x128xf32>
    %31 = arith.maximumf %30, %28 : vector<8x128xf32>
    %32 = arith.subf %19, %31 : vector<8x128xf32>
    %33 = math.exp %32 : vector<8x128xf32>
    %34 = arith.subf %22, %31 : vector<8x128xf32>
    %35 = math.exp %34 : vector<8x128xf32>
    %36 = arith.addf %33, %35 : vector<8x128xf32>
    %37 = arith.subf %25, %31 : vector<8x128xf32>
    %38 = math.exp %37 : vector<8x128xf32>
    %39 = arith.addf %36, %38 : vector<8x128xf32>
    %40 = arith.subf %28, %31 : vector<8x128xf32>
    %41 = math.exp %40 : vector<8x128xf32>
    %42 = arith.addf %39, %41 : vector<8x128xf32>
    %43 = math.log %42 : vector<8x128xf32>
    %44 = arith.addf %31, %43 : vector<8x128xf32>
    %c0_i32_20 = arith.constant 0 : i32
    %45 = vector.broadcast %c0_i32_20 : i32 to vector<8x128xi32>
    %46 = arith.cmpi eq, %16, %45 : vector<8x128xi32>
    %47 = arith.extui %46 : vector<8x128xi1> to vector<8x128xi32>
    %48 = arith.sitofp %47 : vector<8x128xi32> to vector<8x128xf32>
    %cst_21 = arith.constant dense<0.000000e+00> : vector<8x128xf32>
    %49 = tpu.matmul %3, %48, %cst_21 {dimension_numbers = #tpu.dot_dimension_numbers<[1], [0], [0], [1], [0, 0, 1, 1], [], []>, precision = #tpu.contract_precision<fp32>} : vector<8x8xf32>, vector<8x128xf32>, vector<8x128xf32> -> vector<8x128xf32>
    %50 = arith.addf %4, %49 : vector<8x128xf32>
    %51 = arith.subf %19, %44 : vector<8x128xf32>
    %cst_22 = arith.constant 0.000000e+00 : f32
    %52 = vector.broadcast %cst_22 : f32 to vector<8x128xf32>
    %53 = arith.select %46, %51, %52 : vector<8x128xi1>, vector<8x128xf32>
    %cst_23 = arith.constant dense<0.000000e+00> : vector<8x128xf32>
    %54 = tpu.matmul %3, %53, %cst_23 {dimension_numbers = #tpu.dot_dimension_numbers<[1], [0], [0], [1], [0, 0, 1, 1], [], []>, precision = #tpu.contract_precision<fp32>} : vector<8x8xf32>, vector<8x128xf32>, vector<8x128xf32> -> vector<8x128xf32>
    %55 = arith.addf %8, %54 : vector<8x128xf32>
    %c1_i32 = arith.constant 1 : i32
    %56 = vector.broadcast %c1_i32 : i32 to vector<8x128xi32>
    %57 = arith.cmpi eq, %16, %56 : vector<8x128xi32>
    %58 = arith.extui %57 : vector<8x128xi1> to vector<8x128xi32>
    %59 = arith.sitofp %58 : vector<8x128xi32> to vector<8x128xf32>
    %cst_24 = arith.constant dense<0.000000e+00> : vector<8x128xf32>
    %60 = tpu.matmul %3, %59, %cst_24 {dimension_numbers = #tpu.dot_dimension_numbers<[1], [0], [0], [1], [0, 0, 1, 1], [], []>, precision = #tpu.contract_precision<fp32>} : vector<8x8xf32>, vector<8x128xf32>, vector<8x128xf32> -> vector<8x128xf32>
    %61 = arith.addf %5, %60 : vector<8x128xf32>
    %62 = arith.subf %22, %44 : vector<8x128xf32>
    %cst_25 = arith.constant 0.000000e+00 : f32
    %63 = vector.broadcast %cst_25 : f32 to vector<8x128xf32>
    %64 = arith.select %57, %62, %63 : vector<8x128xi1>, vector<8x128xf32>
    %cst_26 = arith.constant dense<0.000000e+00> : vector<8x128xf32>
    %65 = tpu.matmul %3, %64, %cst_26 {dimension_numbers = #tpu.dot_dimension_numbers<[1], [0], [0], [1], [0, 0, 1, 1], [], []>, precision = #tpu.contract_precision<fp32>} : vector<8x8xf32>, vector<8x128xf32>, vector<8x128xf32> -> vector<8x128xf32>
    %66 = arith.addf %9, %65 : vector<8x128xf32>
    %c2_i32 = arith.constant 2 : i32
    %67 = vector.broadcast %c2_i32 : i32 to vector<8x128xi32>
    %68 = arith.cmpi eq, %16, %67 : vector<8x128xi32>
    %69 = arith.extui %68 : vector<8x128xi1> to vector<8x128xi32>
    %70 = arith.sitofp %69 : vector<8x128xi32> to vector<8x128xf32>
    %cst_27 = arith.constant dense<0.000000e+00> : vector<8x128xf32>
    %71 = tpu.matmul %3, %70, %cst_27 {dimension_numbers = #tpu.dot_dimension_numbers<[1], [0], [0], [1], [0, 0, 1, 1], [], []>, precision = #tpu.contract_precision<fp32>} : vector<8x8xf32>, vector<8x128xf32>, vector<8x128xf32> -> vector<8x128xf32>
    %72 = arith.addf %6, %71 : vector<8x128xf32>
    %73 = arith.subf %25, %44 : vector<8x128xf32>
    %cst_28 = arith.constant 0.000000e+00 : f32
    %74 = vector.broadcast %cst_28 : f32 to vector<8x128xf32>
    %75 = arith.select %68, %73, %74 : vector<8x128xi1>, vector<8x128xf32>
    %cst_29 = arith.constant dense<0.000000e+00> : vector<8x128xf32>
    %76 = tpu.matmul %3, %75, %cst_29 {dimension_numbers = #tpu.dot_dimension_numbers<[1], [0], [0], [1], [0, 0, 1, 1], [], []>, precision = #tpu.contract_precision<fp32>} : vector<8x8xf32>, vector<8x128xf32>, vector<8x128xf32> -> vector<8x128xf32>
    %77 = arith.addf %10, %76 : vector<8x128xf32>
    %c3_i32 = arith.constant 3 : i32
    %78 = vector.broadcast %c3_i32 : i32 to vector<8x128xi32>
    %79 = arith.cmpi eq, %16, %78 : vector<8x128xi32>
    %80 = arith.extui %79 : vector<8x128xi1> to vector<8x128xi32>
    %81 = arith.sitofp %80 : vector<8x128xi32> to vector<8x128xf32>
    %cst_30 = arith.constant dense<0.000000e+00> : vector<8x128xf32>
    %82 = tpu.matmul %3, %81, %cst_30 {dimension_numbers = #tpu.dot_dimension_numbers<[1], [0], [0], [1], [0, 0, 1, 1], [], []>, precision = #tpu.contract_precision<fp32>} : vector<8x8xf32>, vector<8x128xf32>, vector<8x128xf32> -> vector<8x128xf32>
    %83 = arith.addf %7, %82 : vector<8x128xf32>
    %84 = arith.subf %28, %44 : vector<8x128xf32>
    %cst_31 = arith.constant 0.000000e+00 : f32
    %85 = vector.broadcast %cst_31 : f32 to vector<8x128xf32>
    %86 = arith.select %79, %84, %85 : vector<8x128xi1>, vector<8x128xf32>
    %cst_32 = arith.constant dense<0.000000e+00> : vector<8x128xf32>
    %87 = tpu.matmul %3, %86, %cst_32 {dimension_numbers = #tpu.dot_dimension_numbers<[1], [0], [0], [1], [0, 0, 1, 1], [], []>, precision = #tpu.contract_precision<fp32>} : vector<8x8xf32>, vector<8x128xf32>, vector<8x128xf32> -> vector<8x128xf32>
    %88 = arith.addf %11, %87 : vector<8x128xf32>
    %c1_i32_33 = arith.constant 1 : i32
    %c0_34 = arith.constant 0 : index
    %c0_35 = arith.constant 0 : index
    %89 = vector.load %arg5[%c0_34, %c0_35] : memref<8x128xf32, #tpu.memory_space<vmem>>, vector<1x128xf32>
    %90 = vector.extract_strided_slice %50 {offsets = [0, 0], sizes = [1, 128], strides = [1, 1]} : vector<8x128xf32> to vector<1x128xf32>
    %91 = arith.addf %89, %90 : vector<1x128xf32>
    %c0_36 = arith.constant 0 : index
    %c0_37 = arith.constant 0 : index
    %92 = vector.load %arg5[%c0_36, %c0_37] : memref<8x128xf32, #tpu.memory_space<vmem>>, vector<1x128xf32>
    tpu.vector_store %arg5[%c0_36, %c0_37], %91 {strides = array<i32>} : memref<8x128xf32, #tpu.memory_space<vmem>>, vector<1x128xf32>,
    %c1_38 = arith.constant 1 : index
    %c0_39 = arith.constant 0 : index
    %93 = vector.load %arg5[%c1_38, %c0_39] : memref<8x128xf32, #tpu.memory_space<vmem>>, vector<1x128xf32>
    %94 = vector.extract_strided_slice %61 {offsets = [0, 0], sizes = [1, 128], strides = [1, 1]} : vector<8x128xf32> to vector<1x128xf32>
    %95 = arith.addf %93, %94 : vector<1x128xf32>
    %c1_40 = arith.constant 1 : index
    %c0_41 = arith.constant 0 : index
    %96 = vector.load %arg5[%c1_40, %c0_41] : memref<8x128xf32, #tpu.memory_space<vmem>>, vector<1x128xf32>
    tpu.vector_store %arg5[%c1_40, %c0_41], %95 {strides = array<i32>} : memref<8x128xf32, #tpu.memory_space<vmem>>, vector<1x128xf32>,
    %c2_42 = arith.constant 2 : index
    %c0_43 = arith.constant 0 : index
    %97 = vector.load %arg5[%c2_42, %c0_43] : memref<8x128xf32, #tpu.memory_space<vmem>>, vector<1x128xf32>
    %98 = vector.extract_strided_slice %72 {offsets = [0, 0], sizes = [1, 128], strides = [1, 1]} : vector<8x128xf32> to vector<1x128xf32>
    %99 = arith.addf %97, %98 : vector<1x128xf32>
    %c2_44 = arith.constant 2 : index
    %c0_45 = arith.constant 0 : index
    %100 = vector.load %arg5[%c2_44, %c0_45] : memref<8x128xf32, #tpu.memory_space<vmem>>, vector<1x128xf32>
    tpu.vector_store %arg5[%c2_44, %c0_45], %99 {strides = array<i32>} : memref<8x128xf32, #tpu.memory_space<vmem>>, vector<1x128xf32>,
    %c3_46 = arith.constant 3 : index
    %c0_47 = arith.constant 0 : index
    %101 = vector.load %arg5[%c3_46, %c0_47] : memref<8x128xf32, #tpu.memory_space<vmem>>, vector<1x128xf32>
    %102 = vector.extract_strided_slice %83 {offsets = [0, 0], sizes = [1, 128], strides = [1, 1]} : vector<8x128xf32> to vector<1x128xf32>
    %103 = arith.addf %101, %102 : vector<1x128xf32>
    %c3_48 = arith.constant 3 : index
    %c0_49 = arith.constant 0 : index
    %104 = vector.load %arg5[%c3_48, %c0_49] : memref<8x128xf32, #tpu.memory_space<vmem>>, vector<1x128xf32>
    tpu.vector_store %arg5[%c3_48, %c0_49], %103 {strides = array<i32>} : memref<8x128xf32, #tpu.memory_space<vmem>>, vector<1x128xf32>,
    %c4 = arith.constant 4 : index
    %c0_50 = arith.constant 0 : index
    %105 = vector.load %arg5[%c4, %c0_50] : memref<8x128xf32, #tpu.memory_space<vmem>>, vector<1x128xf32>
    %106 = vector.extract_strided_slice %55 {offsets = [0, 0], sizes = [1, 128], strides = [1, 1]} : vector<8x128xf32> to vector<1x128xf32>
    %107 = arith.addf %105, %106 : vector<1x128xf32>
    %c4_51 = arith.constant 4 : index
    %c0_52 = arith.constant 0 : index
    %108 = vector.load %arg5[%c4_51, %c0_52] : memref<8x128xf32, #tpu.memory_space<vmem>>, vector<1x128xf32>
    tpu.vector_store %arg5[%c4_51, %c0_52], %107 {strides = array<i32>} : memref<8x128xf32, #tpu.memory_space<vmem>>, vector<1x128xf32>,
    %c5 = arith.constant 5 : index
    %c0_53 = arith.constant 0 : index
    %109 = vector.load %arg5[%c5, %c0_53] : memref<8x128xf32, #tpu.memory_space<vmem>>, vector<1x128xf32>
    %110 = vector.extract_strided_slice %66 {offsets = [0, 0], sizes = [1, 128], strides = [1, 1]} : vector<8x128xf32> to vector<1x128xf32>
    %111 = arith.addf %109, %110 : vector<1x128xf32>
    %c5_54 = arith.constant 5 : index
    %c0_55 = arith.constant 0 : index
    %112 = vector.load %arg5[%c5_54, %c0_55] : memref<8x128xf32, #tpu.memory_space<vmem>>, vector<1x128xf32>
    tpu.vector_store %arg5[%c5_54, %c0_55], %111 {strides = array<i32>} : memref<8x128xf32, #tpu.memory_space<vmem>>, vector<1x128xf32>,
    %c6 = arith.constant 6 : index
    %c0_56 = arith.constant 0 : index
    %113 = vector.load %arg5[%c6, %c0_56] : memref<8x128xf32, #tpu.memory_space<vmem>>, vector<1x128xf32>
    %114 = vector.extract_strided_slice %77 {offsets = [0, 0], sizes = [1, 128], strides = [1, 1]} : vector<8x128xf32> to vector<1x128xf32>
    %115 = arith.addf %113, %114 : vector<1x128xf32>
    %c6_57 = arith.constant 6 : index
    %c0_58 = arith.constant 0 : index
    %116 = vector.load %arg5[%c6_57, %c0_58] : memref<8x128xf32, #tpu.memory_space<vmem>>, vector<1x128xf32>
    tpu.vector_store %arg5[%c6_57, %c0_58], %115 {strides = array<i32>} : memref<8x128xf32, #tpu.memory_space<vmem>>, vector<1x128xf32>,
    %c7 = arith.constant 7 : index
    %c0_59 = arith.constant 0 : index
    %117 = vector.load %arg5[%c7, %c0_59] : memref<8x128xf32, #tpu.memory_space<vmem>>, vector<1x128xf32>
    %118 = vector.extract_strided_slice %88 {offsets = [0, 0], sizes = [1, 128], strides = [1, 1]} : vector<8x128xf32> to vector<1x128xf32>
    %119 = arith.addf %117, %118 : vector<1x128xf32>
    %c7_60 = arith.constant 7 : index
    %c0_61 = arith.constant 0 : index
    %120 = vector.load %arg5[%c7_60, %c0_61] : memref<8x128xf32, #tpu.memory_space<vmem>>, vector<1x128xf32>
    tpu.vector_store %arg5[%c7_60, %c0_61], %119 {strides = array<i32>} : memref<8x128xf32, #tpu.memory_space<vmem>>, vector<1x128xf32>,
    %c0_i32_62 = arith.constant 0 : i32
    %121 = arith.cmpi eq, %arg1, %c0_i32_62 : i32
    %122 = arith.extui %121 : i1 to i32
    %c0_i32_63 = arith.constant 0 : i32
    %123 = arith.cmpi ne, %122, %c0_i32_63 : i32
    scf.if %123 {
      %c0_64 = arith.constant 0 : index
      %c0_65 = arith.constant 0 : index
      %124 = vector.load %arg5[%c0_64, %c0_65] : memref<8x128xf32, #tpu.memory_space<vmem>>, vector<8x128xf32>
      %cst_66 = arith.constant dense<0.000000e+00> : vector<8xf32>
      %125 = vector.multi_reduction <add>, %124, %cst_66 [1] : vector<8x128xf32> to vector<8xf32>
      %126 = vector.shape_cast %125 : vector<8xf32> to vector<8x1xf32>
      %127 = vector.extract_strided_slice %126 {offsets = [0, 0], sizes = [4, 1], strides = [1, 1]} : vector<8x1xf32> to vector<4x1xf32>
      %128 = vector.extract_strided_slice %126 {offsets = [4, 0], sizes = [4, 1], strides = [1, 1]} : vector<8x1xf32> to vector<4x1xf32>
      %129 = vector.shape_cast %127 : vector<4x1xf32> to vector<1x4x1xf32>
      %cst_67 = arith.constant dense<0.000000e+00> : vector<1xf32>
      %130 = vector.multi_reduction <add>, %129, %cst_67 [1, 2] : vector<1x4x1xf32> to vector<1xf32>
      %131 = vector.shape_cast %130 : vector<1xf32> to vector<1x1x1xf32>
      %132 = vector.extract %131[0, 0, 0] : f32 from vector<1x1x1xf32>
      %133 = vector.broadcast %132 : f32 to vector<4x1xf32>
      %134 = arith.divf %127, %133 : vector<4x1xf32>
      %cst_68 = arith.constant 0.000000e+00 : f32
      %135 = vector.broadcast %cst_68 : f32 to vector<4x1xf32>
      %136 = arith.cmpf one, %134, %135 : vector<4x1xf32>
      %137 = arith.extui %136 : vector<4x1xi1> to vector<4x1xi32>
      %138 = arith.sitofp %137 : vector<4x1xi32> to vector<4x1xf32>
      %cst_69 = arith.constant 1.000000e+00 : f32
      %139 = vector.broadcast %cst_69 : f32 to vector<4x1xf32>
      %140 = arith.mulf %138, %139 : vector<4x1xf32>
      %cst_70 = arith.constant 1.000000e+00 : f32
      %141 = vector.broadcast %cst_70 : f32 to vector<4x1xf32>
      %142 = arith.subf %141, %134 : vector<4x1xf32>
      %143 = arith.mulf %140, %142 : vector<4x1xf32>
      %cst_71 = arith.constant 1.000000e+00 : f32
      %144 = vector.broadcast %cst_71 : f32 to vector<4x1xf32>
      %145 = arith.addf %143, %144 : vector<4x1xf32>
      %146 = arith.mulf %145, %128 : vector<4x1xf32>
      %147 = vector.shape_cast %146 : vector<4x1xf32> to vector<1x4x1xf32>
      %cst_72 = arith.constant dense<0.000000e+00> : vector<1xf32>
      %148 = vector.multi_reduction <add>, %147, %cst_72 [1, 2] : vector<1x4x1xf32> to vector<1xf32>
      %149 = vector.shape_cast %148 : vector<1xf32> to vector<1x1x1xf32>
      %150 = vector.extract %149[0, 0, 0] : f32 from vector<1x1x1xf32>
      %cst_73 = arith.constant 0.000000e+00 : f32
      %151 = arith.subf %cst_73, %150 : f32
      %152 = arith.mulf %145, %127 : vector<4x1xf32>
      %153 = vector.shape_cast %152 : vector<4x1xf32> to vector<1x4x1xf32>
      %cst_74 = arith.constant dense<0.000000e+00> : vector<1xf32>
      %154 = vector.multi_reduction <add>, %153, %cst_74 [1, 2] : vector<1x4x1xf32> to vector<1xf32>
      %155 = vector.shape_cast %154 : vector<1xf32> to vector<1x1x1xf32>
      %156 = vector.extract %155[0, 0, 0] : f32 from vector<1x1x1xf32>
      %157 = arith.divf %151, %156 : f32
      %158 = vector.broadcast %157 : f32 to vector<1x1x128xf32>
      %c0_75 = arith.constant 0 : index
      %c0_76 = arith.constant 0 : index
      %c0_77 = arith.constant 0 : index
      %159 = vector.load %arg4[%c0_75, %c0_76, %c0_77] : memref<1x1x128xf32, #tpu.memory_space<vmem>>, vector<1x1x128xf32>
      tpu.vector_store %arg4[%c0_75, %c0_76, %c0_77], %158 {strides = array<i32>} : memref<1x1x128xf32, #tpu.memory_space<vmem>>, vector<1x1x128xf32>,
    } else {
    }
    return
  }
  func.func @transform_0(%arg0: i32, %arg1: i32) -> (i32, i32, i32, i32) {
    %c0_i32 = arith.constant 0 : i32
    %c0_i32_0 = arith.constant 0 : i32
    %c0_i32_1 = arith.constant 0 : i32
    return %arg0, %c0_i32, %arg1, %c0_i32_0 : i32, i32, i32, i32
  }
  func.func @transform_1(%arg0: i32, %arg1: i32) -> (i32, i32, i32) {
    %c0_i32 = arith.constant 0 : i32
    %c0_i32_0 = arith.constant 0 : i32
    return %arg0, %arg1, %c0_i32 : i32, i32, i32
  }
  func.func @transform_2(%arg0: i32, %arg1: i32) -> (i32, i32, i32) {
    %c0_i32 = arith.constant 0 : i32
    %c0_i32_0 = arith.constant 0 : i32
    %c0_i32_1 = arith.constant 0 : i32
    return %arg0, %c0_i32, %c0_i32_0 : i32, i32, i32
  }
}

</mosaic_0001>

<bundles_post_ra>
// kernel: tpu_custom_call.1
= control target key start
LH: loop header
LB: loop body
LE: loop exit
PB: predicated region body
PF: predicated region fallthrough
CT: control target
= control target key end

     0   :  { %7 = vsyncpa [#allocation4], 0  ;;  %s5256_s0 = inlined_call_operand.hbm [shape: f32[2,4,8,128], index: 0, kind: input, shape index: {}]   ;;  %s5257_s1 = inlined_call_operand.hbm [shape: s32[2,8,128], index: 1, kind: input, shape index: {}]   ;;  %s5258_s2 = inlined_call_operand.hbm [shape: f32[2,1,128], index: 2, kind: output, shape index: {}]  }
   0x1   :  { %9 = vsyncpa [#allocation4 + $0x1], 0 }
   0x2   :  { %10 = vsyncpa [#allocation7], 0 }
   0x3   :  { %12 = vsyncpa [#allocation7 + $0x1], 0 }
   0x4   :  { %13 = vsyncpa [#allocation5], 0 }
   0x5   :  { %15 = vsyncpa [#allocation5 + $0x1], 0  ;;  %s4706_s9 = smov 0   ;;  %s4708_s10 = smov 0  }
   0x6   :  { %s4710_s11 = smov 0   ;;  %s4712_s12 = smov 0  }
   0x7   :  { %s4714_s13 = smov 0   ;;  %s4716_s14 = smov 0  }
   0x8 LB: > { %s4043_s15 = sadd.s32 4294967295, %s4680_s14   ;;  %s4044_s16 = sadd.s32 4294967294, %s4680_s14   ;;  %s4680_s14 = sphi %s4716_s14, %s21_s14   ;;  %s4676_s13 = sphi %s4714_s13, %s5277_s13   ;;  %s4672_s12 = sphi %s4712_s12, %s5276_s12   ;;  %s4668_s11 = sphi %s4710_s11, %s5275_s11   ;;  %s4664_s10 = sphi %s4708_s10, %s5274_s10   ;;  %s4660_s9 = sphi %s4706_s9, %s5273_s9  }
   0x9   : > { %s33_s17 = sadd.s32 1, %s4676_s13  ;;  %s42_s18 = sadd.s32 1, %s4668_s11 }
   0xa   : > { %p35_p0 = scmp.ge.s32.totalorder %s33_s17, 2  ;;  %p49_p1 = scmp.ne.s32.totalorder %s4668_s11, %s4664_s10 }
   0xb   : > { %p50_p2 = scmp.eq.s32.totalorder %s4680_s14, 0  ;;  %p55_p3 = scmp.ne.s32.totalorder %s4664_s10, %s4660_s9 }
   0xc   : > { %s5279_s17 = smov (%p35_p0, %s33_s17), 0  ;;  %p56_p5 = scmp.eq.s32.totalorder %s4043_s15, 0 }
   0xd   : > { %p4747_p4 = por %p50_p2, %p49_p1  ;;  %s37_s20 = ssub.s32 %s4676_s13, %s5279_s17 }
   0xe   : > { %p107_p6 = scmp.eq.s32.totalorder %s4043_s15, 1  ;;  %p40_p7 = scmp.eq.s32.totalorder %s37_s20, 0 }
   0xf   : > { %p4753_p8 = por %p56_p5, %p55_p3  ;;  %p113_p10 = scmp.eq.s32.totalorder %s4044_s16, 1 }
  0x10   : > { %p4757_p9 = por %p107_p6, %p49_p1  ;;  %p4464_p13 = scmp.lt.s32.totalorder %s4680_s14, 2 }
  0x11   : > { %s5262_s21 = scalar_select %p4753_p8, 1, 0 }
  0x12   : > { %s5263_s22 = scalar_select %p4757_p9, 1, 0 }
  0x13   : > { %s4762_s23 = scalar_select %p40_p7, %s4668_s11, %s42_s18  }
  0x14   : > { %p4764_p11 = por %p113_p10, %p55_p3  ;;  %s4771_s25 = sand.u32 1, %s4668_s11  }
  0x15   : > { %s4047_s26 = sshll.u32 %s4771_s25, 5  ;;  %s4102_s27 = sshll.u32 %s4676_s13, 9 }
  0x16   : > { %s5264_s24 = scalar_select %p4764_p11, 1, 0 }
  0x17   : > { %s4778_s30 = scalar_lea.hbm %s5256_s0, %s4102_s27  ;;  %s137_s3 = scalar_lea.vmem [#allocation3], %s4047_s26 }
  0x18   : > { %s145_s4 = sshll.u32 %s137_s3, 4  ;;  %p4784_p0 = pnand %p4464_p13, %p4747_p4  ;;  %s4780_s4 = int_to_ptr.vmem [resolvable:$true] %s145_s4 }
  0x19   : > { %s134_s6 = scalar_lea.sflag [#allocation4], %s4771_s25  ;;  %s4534_s7 = scalar_lea.hbm %s4778_s30, 512 }
  0x1a   : > { %p4535_p2 = scmp.ne.s32.totalorder %s4778_s30, %s4534_s7  ;;  %p4536_p3 = pneg %p4784_p0 }
  0x1b   : > { %s4539_s16 = scalar_lea.hbm %s5256_s0, 1024  ;;  %p4540_p4 = scmp.lt.u32.totalorder %s4778_s30, %s5256_s0 }
  0x1c   : > { %p4537_p5 = pnand %p4536_p3, %p4535_p2  ;;  %p4541_p7 = scmp.lt.u32.totalorder %s4539_s16, %s4534_s7 }
  0x1d   : > { %p4543_p13 = scmp.lt.u32.totalorder %s4534_s7, %s4778_s30 }
  0x1e   : > { %p4538_p6 = pneg %p4537_p5  ;;  %p4542_p10 = por %p4541_p7, %p4540_p4 }
  0x20   : > { %p4544_p12 = por %p4543_p13, %p4542_p10 }
  0x22   : > { %p4545_p1 = pnand %p4544_p12, %p4538_p6 }
  0x24   : > { %4548 = shalt.err (!%p4545_p1)
}
  0x25   : > { %s4549_s20 = scalar_lea.vmem %s4780_s4, 512  ;;  %s4682_s26 = smov [#allocation3]  }
  0x26   : > { %p4550_p2 = scmp.ne.s32.totalorder %s4780_s4, %s4549_s20  ;;  %s4554_s27 = sshll.u32 %s4682_s26, 4  ;;  %s4555_s27 = int_to_ptr.vmem [resolvable:$false] %s4554_s27 }
  0x27   : > { %s4556_s28 = scalar_lea.vmem %s4555_s27, 1024  ;;  %p4557_p9 = scmp.lt.s32.totalorder %s4780_s4, %s4555_s27 }
  0x28   : > { %p4552_p5 = pnand %p4550_p2, %p4536_p3  ;;  %p4558_p4 = scmp.lt.s32.totalorder %s4556_s28, %s4549_s20 }
  0x2a   : > { %p4553_p11 = pneg %p4552_p5  ;;  %p4559_p7 = por %p4558_p4, %p4557_p9 }
  0x2c   : > { %p4560_p10 = pnand %p4559_p7, %p4553_p11 }
  0x2e   : > { %4563 = shalt.err (!%p4560_p10)
}
  0x2f   : > { %s4683_s29 = smov 128   ;;  %s4684_s3 = smov 8  }
  0x30   : > { %4456 = dma.hbm_to_vmem [thread:$0]  (!%p4784_p0), %s4778_s30, 512, %s4780_s4, %s134_s6, %s4683_s29, %s4683_s29, %s4684_s3  }
  0x31   : > { %p172_p12 = scmp.lt.s32.totalorder %s4680_s14, 3  ;;  %s4050_s7 = sshll.u32 %s4771_s25, 3 }
  0x32   : > { %s4051_s8 = sshll.u32 %s4676_s13, 7  ;;  %p5266_p9 = scmp.ge.s32.totalorder %s4680_s14, 1 }
  0x33   : > { %s4829_s19 = scalar_lea.hbm %s5257_s1, %s4051_s8  ;;  %s159_s20 = scalar_lea.vmem [#allocation6], %s4050_s7 }
  0x34   : > { %p4822_p11 = pnand %p5266_p9, %p172_p12  ;;  %s167_s26 = sshll.u32 %s159_s20, 4  ;;  %s168_s26 = int_to_ptr.vmem [resolvable:$true] %s167_s26 }
  0x35   : > { %s156_s30 = scalar_lea.sflag [#allocation7], %s4771_s25  ;;  %s4564_s4 = scalar_lea.hbm %s4829_s19, 128 }
  0x36   : > { %s5267_s15 = scalar_select %p4822_p11, 1, 0 }
  0x37   : > { %p4565_p1 = scmp.ne.s32.totalorder %s4829_s19, %s4564_s4  ;;  %s4569_s28 = scalar_lea.hbm %s5257_s1, 256 }
  0x38   : > { %p4570_p2 = scmp.lt.u32.totalorder %s4829_s19, %s5257_s1  ;;  %p4571_p5 = scmp.lt.u32.totalorder %s4569_s28, %s4564_s4 }
  0x39   : > { %p4567_p6 = pnand %p4565_p1, %p4536_p3  ;;  %p4573_p7 = scmp.lt.u32.totalorder %s4564_s4, %s4829_s19 }
  0x3a   : > { %p4572_p4 = por %p4571_p5, %p4570_p2 }
  0x3b   : > { %p4568_p13 = pneg %p4567_p6 }
  0x3c   : > { %p4574_p10 = por %p4573_p7, %p4572_p4 }
  0x3e   : > { %p4575_p12 = pnand %p4574_p10, %p4568_p13 }
  0x40   : > { %4578 = shalt.err (!%p4575_p12)
}
  0x41   : > { %s4579_s25 = scalar_lea.vmem %s168_s26, 128  ;;  %s4685_s7 = smov [#allocation6]  }
  0x42   : > { %p4580_p9 = scmp.ne.s32.totalorder %s168_s26, %s4579_s25  ;;  %s4584_s8 = sshll.u32 %s4685_s7, 4  ;;  %s4585_s8 = int_to_ptr.vmem [resolvable:$false] %s4584_s8 }
  0x43   : > { %s4586_s16 = scalar_lea.vmem %s4585_s8, 256  ;;  %p4587_p8 = scmp.lt.s32.totalorder %s168_s26, %s4585_s8 }
  0x44   : > { %p4582_p1 = pnand %p4580_p9, %p4536_p3  ;;  %p4588_p11 = scmp.lt.s32.totalorder %s4586_s16, %s4579_s25 }
  0x46   : > { %p4583_p6 = pneg %p4582_p1  ;;  %p4589_p2 = por %p4588_p11, %p4587_p8 }
  0x48   : > { %p4590_p5 = pnand %p4589_p2, %p4583_p6 }
  0x4a   : > { %4593 = shalt.err (!%p4590_p5)
}
  0x4b   : > { %4459 = dma.hbm_to_vmem [thread:$0]  (!%p4784_p0), %s4829_s19, 128, %s168_s26, %s156_s30  }
  0x4c   : > { %p5268_p13 = scmp.ne.s32.totalorder %s5267_s15, 0 }
  0x4d   : > { %s4854_s18 = sand.u32 (!%p5268_p13), 1, %s4664_s10   ;;  %p5269_p8 = scmp.ne.s32.totalorder (!%p5268_p13), %s5262_s21, 0 }
  0x4e   : > { %176 = sbr.rel (%p5268_p13) target bundleno = 1109 (0x455), region = 28  ;;  %s4053_s20 = sshll.u32 (!%p5268_p13), %s4854_s18, 5 }
  0x4f   : > { %s179_s4 = scalar_lea.sflag (!%p5268_p13), [#allocation4], %s4854_s18  ;;  %s4858_s6 = scalar_lea.vmem (!%p5268_p13), [#allocation3], %s4053_s20 }
  0x55   : > { %4647 = dma.done.wait (%p5269_p8), %s179_s4, 512  }
  0x56   : > { %4649 = vsyncadd (%p5269_p8), %s179_s4, 4294966784  ;;  %s4054_s5 = sshll.u32 %s4854_s18, 3  ;;  %s188_s15 = scalar_lea.sflag [#allocation7], %s4854_s18 }
  0x57   : > { %s191_s19 = scalar_lea.vmem [#allocation6], %s4054_s5 }
  0x58   : > { %4651 = dma.done.wait (%p5269_p8), %s188_s15, 128  }
  0x59   : > { %4653 = vsyncadd (%p5269_p8), %s188_s15, 4294967168  ;;  %vm256_vm0 = vcmask 64512   ;;  %v4686_v0 = vmov 0.0   ;;  %vm4687_vm1 = vmmov 0   ;;  %v4688_v1 = vmov 0   ;;  %v4883_v5 = vld [vmem:[%s191_s19] sm:$0xff] }
  0x5a   : > { %4199 = vmatprep.subr.mxu0 %v4686_v0  ;;  %220 = vst [vmem:[#allocation2] sm:$0xff] %v4686_v0  ;;  %4201 = vmatprep.mubr.msk.f32.mxu0 %vm4687_vm1, %v4686_v0  ;;  %v258_v2 = vsel %vm256_vm0, 1.0, %v4688_v1  ;;  %v4888_v7 = vld [vmem:[%s4858_s6] sm:$0xff]  ;;  %v4891_v8 = vld [vmem:[%s4858_s6 + $0x8] sm:$0xff]  ;;  %vm253_vm2 = vcmp.eq.s32.totalorder %v4883_v5, 0  ;;  %v4895_v9 = vld [vmem:[%s4858_s6 + $0x10] sm:$0xff] }
  0x5b   : > { %4204 = vmatprep.subr.mxu1 %v4686_v0  ;;  %4206 = vmatprep.mubr.msk.f32.mxu1 %vm4687_vm1, %v4686_v0  ;;  %v4878_v3 = vsub.f32 %v258_v2, %v258_v2  ;;  %v232_v10 = vmax.f32 %v4888_v7, %v4891_v8  ;;  %v4689_v11 = vmov 1.0   ;;  %v4058_v13 = vsel %vm253_vm2, 1.0, %v4686_v0  ;;  %v4057_v14 = vld [vmem:[%s4858_s6 + $0x18] sm:$0xff]  ;;  %s4099_s27 = sshll.u32 %s4672_s12, 4  ;;  %s215_s29 = scalar_lea.vmem [#allocation8], %s4854_s18 }
  0x5c   : > { %4200 = vmatpush3.msk.msra.mxu0 %vm253_vm2, %v4689_v11  ;;  %v338_v15 = vsub.f32 %v4058_v13, %v4058_v13  ;;  %vm1154_vm3 = vcmp.eq.s32.totalorder %v4883_v5, 1  ;;  %vm2051_vm4 = vcmp.eq.s32.totalorder %v4883_v5, 2  ;;  %vm2948_vm5 = vcmp.eq.s32.totalorder %v4883_v5, 3  ;;  %s3940_s3 = sshll.u32 %s215_s29, 4  ;;  %s5207_s20 = scalar_lea.hbm %s5258_s2, %s4099_s27  ;;  %s5209_s3 = int_to_ptr.vmem [resolvable:$true] %s3940_s3 }
  0x5d   : > { %v4881_v4 = vand.u32 4294901760, %v4878_v3  ;;  %4209 = vmatprep.subr.mxu0 %v4686_v0  ;;  %v233_v16 = vmax.f32 %v232_v10, %v4895_v9  ;;  %v4068_v46 = vsel %vm1154_vm3, 1.0, %v4686_v0  ;;  %v4078_v61 = vsel %vm2051_vm4, 1.0, %v4686_v0  ;;  %s3928_s4 = scalar_lea.sflag [#allocation5], %s4854_s18  ;;  %s4594_s6 = scalar_lea.vmem %s5209_s3, 16 }
  0x5e   : > { %v339_v17 = vand.u32 4294901760, %v338_v15  ;;  %v1235_v49 = vsub.f32 %v4068_v46, %v4068_v46  ;;  %v2132_v63 = vsub.f32 %v4078_v61, %v4078_v61  ;;  %v4088_v13 = vsel %vm2948_vm5, 1.0, %v4686_v0  ;;  %p4595_p0 = scmp.ne.s32.totalorder %s5209_s3, %s4594_s6  ;;  %p5270_p3 = scmp.ne.s32.totalorder %s5263_s22, 0 }
  0x5f   : > { %v329_v6 = vsub.f32 %v4878_v3, %v4881_v4  ;;  %v234_v18 = vmax.f32 %v233_v16, %v4057_v14  ;;  %vm3875_vm6 = vcmask 3072   ;;  %s4690_s12 = smov [#allocation8]  }
  0x60   : > { %v340_v19 = vsub.f32 %v338_v15, %v339_v17  ;;  %v1236_v53 = vand.u32 4294901760, %v1235_v49  ;;  %v2133_v1 = vand.u32 4294901760, %v2132_v63  ;;  %p4596_p11 = pnand %p4595_p0, %p5270_p3  ;;  %s4598_s5 = sshll.u32 %s4690_s12, 4  ;;  %s4599_s5 = int_to_ptr.vmem [resolvable:$false] %s4598_s5 }
  0x61   : > { %v4902_v12 = vand.u32 4294901760, %v329_v6  ;;  %v235_v20 = vsub.f32 %v4888_v7, %v234_v18  ;;  %v238_v21 = vsub.f32 %v4891_v8, %v234_v18  ;;  %v242_v22 = vsub.f32 %v4895_v9, %v234_v18  ;;  %s4600_s15 = scalar_lea.vmem %s4599_s5, 32  ;;  %p4601_p7 = scmp.lt.s32.totalorder %s5209_s3, %s4599_s5 }
  0x62   : > { %v246_v23 = vsub.f32 %v4057_v14, %v234_v18  ;;  %v341_v24 = vand.u32 4294901760, %v340_v19  ;;  %v1237_v55 = vsub.f32 %v1235_v49, %v1236_v53  ;;  %v2134_v2 = vsub.f32 %v2132_v63, %v2133_v1  ;;  %p4597_p4 = pneg %p4596_p11  ;;  %p4602_p10 = scmp.lt.s32.totalorder %s4600_s15, %s4594_s6 }
  0x63   : > { %4202 = vmatmul.mubr.f32.vlgmr.msra.gmra.mrb[0].mxu0 %v4902_v12  ;;  %v236_v25 = vmul.f32 1.442695, %v235_v20  ;;  %v239_v26 = vmul.f32 1.442695, %v238_v21  ;;  %v243_v27 = vmul.f32 1.442695, %v242_v22 }
  0x64   : > { %4210 = vmatpush3.msra.mxu0 %v338_v15  ;;  %4211 = vmatprep.mubr.msk.f32.mxu0 %vm4687_vm1, %v4686_v0  ;;  %v247_v28 = vmul.f32 1.442695, %v246_v23  ;;  %v1238_v57 = vand.u32 4294901760, %v1237_v55  ;;  %v3029_v15 = vsub.f32 %v4088_v13, %v4088_v13  ;;  %v3857_v55 = vld [vmem:[#allocation2 + $0x4] sm:$0x1]  ;;  %p4603_p12 = por %p4602_p10, %p4601_p7 }
  0x65   : > { %4219 = vmatprep.subr.mxu0 %v4686_v0  ;;  %4205 = vmatpush3.msra.mxu1 %v341_v24  ;;  %4520 = vpow2.f32 %v236_v25 }
  0x66   : > { %4207 = vmatmul.mubr.msk.f32.vlgmr.msra.gmra.mrb[0].mxu1 %vm256_vm0, %v4689_v11  ;;  %4214 = vmatprep.subr.mxu1 %v4686_v0  ;;  %4522 = vpow2.f32 %v239_v26  ;;  %v3030_v16 = vand.u32 4294901760, %v3029_v15  ;;  %p4604_p9 = pnand %p4603_p12, %p4597_p4 }
  0x67   : > { %4212 = vmatmul.mubr.f32.vlgmr.msra.gmra.mrb[2].mxu0 %v4878_v3  ;;  %4215 = vmatpush3.msk.msra.mxu1 %vm253_vm2, %v4689_v11  ;;  %4524 = vpow2.f32 %v243_v27 }
  0x68   : > { %4220 = vmatpush3.msra.mxu0 %v339_v17  ;;  %4221 = vmatprep.mubr.msk.f32.mxu0 %vm4687_vm1, %v4686_v0  ;;  %4526 = vpow2.f32 %v247_v28  ;;  %v3031_v17 = vsub.f32 %v3029_v15, %v3030_v16 }
  0x69   : > { %4229 = vmatprep.subr.mxu0 %v4686_v0  ;;  %4216 = vmatprep.mubr.msk.f32.mxu1 %vm4687_vm1, %v4686_v0 }
  0x6a   : > { %4224 = vmatprep.subr.mxu1 %v4686_v0  ;;  %4217 = vmatmul.mubr.f32.vlgmr.msra.gmra.mrb[2].mxu1 %v4881_v4  ;;  %v3032_v19 = vand.u32 4294901760, %v3031_v17 }
  0x6b   : > { %4222 = vmatmul.mubr.msk.f32.vlgmr.msra.gmra.mrb[4].mxu0 %vm256_vm0, %v4689_v11  ;;  %4225 = vmatpush3.msk.msra.mxu1 %vm253_vm2, %v4689_v11 }
  0x6c   : > { %4231 = vmatprep.mubr.msk.f32.mxu0 %vm4687_vm1, %v4686_v0  ;;  %4226 = vmatprep.mubr.msk.f32.mxu1 %vm4687_vm1, %v4686_v0 }
  0x6d   : > { %4234 = vmatprep.subr.mxu1 %v4686_v0 }
  0x6e   : > { %4227 = vmatmul.mubr.msk.f32.vlgmr.msra.gmra.mrb[4].mxu1 %vm256_vm0, %v4689_v11 }
  0x6f   : > { %v4521_v29 = vpop.eup %4520  ;;  %4236 = vmatprep.mubr.msk.f32.mxu1 %vm4687_vm1, %v4686_v0 }
  0x70   : > { %v4523_v30 = vpop.eup %4522 }
  0x71   : > { %v4525_v31 = vpop.eup %4524  ;;  %v241_v32 = vadd.f32 %v4523_v30, %v4521_v29 }
  0x72   : > { %v4527_v33 = vpop.eup %4526 }
  0x73   : > { %v245_v34 = vadd.f32 %v4525_v31, %v241_v32 }
  0x75   : > { %v249_v35 = vadd.f32 %v4527_v33, %v245_v34 }
  0x77   : > { %4528 = vlog2.f32 %v249_v35  ;;  %v3845_v35 = vld [vmem:[#allocation2] sm:$0x1] }
  0x81   : > { %v4529_v36 = vpop.eup %4528 }
  0x82   : > { %v251_v37 = vmul.f32 0.6931472, %v4529_v36 }
  0x84   : > { %v252_v38 = vadd.f32 %v251_v37, %v234_v18 }
  0x86   : > { %v706_v39 = vsub.f32 %v4888_v7, %v252_v38  ;;  %v2500_v40 = vsub.f32 %v4895_v9, %v252_v38  ;;  %v3397_v41 = vsub.f32 %v4057_v14, %v252_v38  ;;  %v1603_v50 = vsub.f32 %v4891_v8, %v252_v38 }
  0x87   : > { %v2135_v7 = vand.u32 4294901760, %v2134_v2 }
  0x88   : > { %v707_v42 = vsel %vm253_vm2, %v706_v39, 0.0  ;;  %v4954_v43 = vsel %vm2051_vm4, %v2500_v40, 0.0  ;;  %v4958_v44 = vsel %vm2948_vm5, %v3397_v41, 0.0  ;;  %v1604_v54 = vsel %vm1154_vm3, %v1603_v50, 0.0 }
  0x89   : > { %v709_v45 = vand.u32 4294901760, %v707_v42  ;;  %v4980_v56 = vand.u32 4294901760, %v1604_v54  ;;  %v5052_v6 = vand.u32 4294901760, %v4954_v43  ;;  %v3400_v18 = vand.u32 4294901760, %v4958_v44 }
  0x8b   : > { %4230 = vmatpush3.msra.mxu0 %v709_v45  ;;  %v786_v47 = vsub.f32 %v707_v42, %v709_v45  ;;  %v1683_v58 = vsub.f32 %v1604_v54, %v4980_v56  ;;  %v2580_v8 = vsub.f32 %v4954_v43, %v5052_v6  ;;  %v3477_v20 = vsub.f32 %v4958_v44, %v3400_v18 }
  0x8c   : > { %4232 = vmatmul.mubr.f32.vlgmr.msra.gmra.mrb[6].mxu0 %v4902_v12  ;;  %4239 = vmatprep.subr.mxu0 %v4686_v0 }
  0x8d   : > { %v787_v48 = vand.u32 4294901760, %v786_v47  ;;  %4240 = vmatpush3.msra.mxu0 %v786_v47  ;;  %4241 = vmatprep.mubr.msk.f32.mxu0 %vm4687_vm1, %v4686_v0  ;;  %v1684_v59 = vand.u32 4294901760, %v1683_v58  ;;  %v2581_v9 = vand.u32 4294901760, %v2580_v8  ;;  %v3478_v21 = vand.u32 4294901760, %v3477_v20 }
  0x8e   : > { %4249 = vmatprep.subr.mxu0 %v4686_v0 }
  0x8f   : > { %v788_v51 = vsub.f32 %v786_v47, %v787_v48  ;;  %v1685_v60 = vsub.f32 %v1683_v58, %v1684_v59  ;;  %v2582_v10 = vsub.f32 %v2580_v8, %v2581_v9  ;;  %v3479_v22 = vsub.f32 %v3477_v20, %v3478_v21 }
  0x90   : > { %4242 = vmatmul.mubr.f32.vlgmr.msra.gmra.mrb[8].mxu0 %v4878_v3 }
  0x91   : > { %v789_v52 = vand.u32 4294901760, %v788_v51  ;;  %4250 = vmatpush3.msra.mxu0 %v787_v48  ;;  %4251 = vmatprep.mubr.msk.f32.mxu0 %vm4687_vm1, %v4686_v0  ;;  %v1686_v62 = vand.u32 4294901760, %v1685_v60  ;;  %v2583_v14 = vand.u32 4294901760, %v2582_v10  ;;  %v3480_v23 = vand.u32 4294901760, %v3479_v22 }
  0x92   : > { %4259 = vmatprep.subr.mxu0 %v4686_v0 }
  0x93   : > { %4235 = vmatpush3.msra.mxu1 %v789_v52 }
  0x94   : > { %4237 = vmatmul.mubr.msk.f32.vlgmr.msra.gmra.mrb[6].mxu1 %vm256_vm0, %v4689_v11  ;;  %4244 = vmatprep.subr.mxu1 %v4686_v0 }
  0x95   : > { %4245 = vmatpush3.msra.mxu1 %v709_v45  ;;  %4246 = vmatprep.mubr.msk.f32.mxu1 %vm4687_vm1, %v4686_v0 }
  0x96   : > { %4252 = vmatmul.mubr.msk.f32.vlgmr.msra.gmra.mrb[10].mxu0 %vm256_vm0, %v4689_v11  ;;  %4254 = vmatprep.subr.mxu1 %v4686_v0 }
  0x97   : > { %4260 = vmatpush3.msk.msra.mxu0 %vm1154_vm3, %v4689_v11  ;;  %4261 = vmatprep.mubr.msk.f32.mxu0 %vm4687_vm1, %v4686_v0 }
  0x98   : > { %4247 = vmatmul.mubr.f32.vlgmr.msra.gmra.mrb[8].mxu1 %v4881_v4  ;;  %4269 = vmatprep.subr.mxu0 %v4686_v0 }
  0x99   : > { %4255 = vmatpush3.msra.mxu1 %v709_v45  ;;  %4256 = vmatprep.mubr.msk.f32.mxu1 %vm4687_vm1, %v4686_v0 }
  0x9a   : > { %4262 = vmatmul.mubr.f32.vlgmr.msra.gmra.mrb[12].mxu0 %v4902_v12  ;;  %4264 = vmatprep.subr.mxu1 %v4686_v0 }
  0x9b   : > { %4270 = vmatpush3.msra.mxu0 %v1235_v49  ;;  %4271 = vmatprep.mubr.msk.f32.mxu0 %vm4687_vm1, %v4686_v0 }
  0x9c   : > { %4257 = vmatmul.mubr.msk.f32.vlgmr.msra.gmra.mrb[10].mxu1 %vm256_vm0, %v4689_v11  ;;  %4279 = vmatprep.subr.mxu0 %v4686_v0 }
  0x9d   : > { %4265 = vmatpush3.msra.mxu1 %v1238_v57  ;;  %4266 = vmatprep.mubr.msk.f32.mxu1 %vm4687_vm1, %v4686_v0 }
  0x9e   : > { %4272 = vmatmul.mubr.f32.vlgmr.msra.gmra.mrb[14].mxu0 %v4878_v3  ;;  %4274 = vmatprep.subr.mxu1 %v4686_v0 }
  0x9f   : > { %4280 = vmatpush3.msra.mxu0 %v1236_v53  ;;  %4281 = vmatprep.mubr.msk.f32.mxu0 %vm4687_vm1, %v4686_v0 }
  0xa0   : > { %4267 = vmatmul.mubr.msk.f32.vlgmr.msra.gmra.mrb[12].mxu1 %vm256_vm0, %v4689_v11  ;;  %4289 = vmatprep.subr.mxu0 %v4686_v0 }
  0xa1   : > { %4275 = vmatpush3.msk.msra.mxu1 %vm1154_vm3, %v4689_v11  ;;  %4276 = vmatprep.mubr.msk.f32.mxu1 %vm4687_vm1, %v4686_v0 }
  0xa2   : > { %4282 = vmatmul.mubr.msk.f32.vlgmr.msra.gmra.mrb[16].mxu0 %vm256_vm0, %v4689_v11  ;;  %4284 = vmatprep.subr.mxu1 %v4686_v0 }
  0xa3   : > { %4290 = vmatpush3.msra.mxu0 %v4980_v56  ;;  %4291 = vmatprep.mubr.msk.f32.mxu0 %vm4687_vm1, %v4686_v0 }
  0xa4   : > { %4277 = vmatmul.mubr.f32.vlgmr.msra.gmra.mrb[14].mxu1 %v4881_v4  ;;  %4299 = vmatprep.subr.mxu0 %v4686_v0 }
  0xa5   : > { %4285 = vmatpush3.msk.msra.mxu1 %vm1154_vm3, %v4689_v11  ;;  %4286 = vmatprep.mubr.msk.f32.mxu1 %vm4687_vm1, %v4686_v0 }
  0xa6   : > { %4292 = vmatmul.mubr.f32.vlgmr.msra.gmra.mrb[18].mxu0 %v4902_v12  ;;  %4294 = vmatprep.subr.mxu1 %v4686_v0 }
  0xa7   : > { %4300 = vmatpush3.msra.mxu0 %v1683_v58  ;;  %4301 = vmatprep.mubr.msk.f32.mxu0 %vm4687_vm1, %v4686_v0 }
  0xa8   : > { %4287 = vmatmul.mubr.msk.f32.vlgmr.msra.gmra.mrb[16].mxu1 %vm256_vm0, %v4689_v11  ;;  %4309 = vmatprep.subr.mxu0 %v4686_v0 }
  0xa9   : > { %4295 = vmatpush3.msra.mxu1 %v1686_v62  ;;  %4296 = vmatprep.mubr.msk.f32.mxu1 %vm4687_vm1, %v4686_v0 }
  0xaa   : > { %4302 = vmatmul.mubr.f32.vlgmr.msra.gmra.mrb[20].mxu0 %v4878_v3  ;;  %4304 = vmatprep.subr.mxu1 %v4686_v0 }
  0xab   : > { %4310 = vmatpush3.msra.mxu0 %v1684_v59  ;;  %4311 = vmatprep.mubr.msk.f32.mxu0 %vm4687_vm1, %v4686_v0 }
  0xac   : > { %4297 = vmatmul.mubr.msk.f32.vlgmr.msra.gmra.mrb[18].mxu1 %vm256_vm0, %v4689_v11  ;;  %4319 = vmatprep.subr.mxu0 %v4686_v0 }
  0xad   : > { %4305 = vmatpush3.msra.mxu1 %v4980_v56  ;;  %4306 = vmatprep.mubr.msk.f32.mxu1 %vm4687_vm1, %v4686_v0 }
  0xae   : > { %4312 = vmatmul.mubr.msk.f32.vlgmr.msra.gmra.mrb[22].mxu0 %vm256_vm0, %v4689_v11  ;;  %4314 = vmatprep.subr.mxu1 %v4686_v0 }
  0xaf   : > { %4320 = vmatpush3.msk.msra.mxu0 %vm2051_vm4, %v4689_v11  ;;  %4321 = vmatprep.mubr.msk.f32.mxu0 %vm4687_vm1, %v4686_v0 }
  0xb0   : > { %4307 = vmatmul.mubr.f32.vlgmr.msra.gmra.mrb[20].mxu1 %v4881_v4  ;;  %4329 = vmatprep.subr.mxu0 %v4686_v0 }
  0xb1   : > { %4315 = vmatpush3.msra.mxu1 %v4980_v56  ;;  %4316 = vmatprep.mubr.msk.f32.mxu1 %vm4687_vm1, %v4686_v0 }
  0xb2   : > { %4322 = vmatmul.mubr.f32.vlgmr.msra.gmra.mrb[24].mxu0 %v4902_v12  ;;  %4324 = vmatprep.subr.mxu1 %v4686_v0 }
  0xb3   : > { %4330 = vmatpush3.msra.mxu0 %v2132_v63  ;;  %4331 = vmatprep.mubr.msk.f32.mxu0 %vm4687_vm1, %v4686_v0 }
  0xb4   : > { %4317 = vmatmul.mubr.msk.f32.vlgmr.msra.gmra.mrb[22].mxu1 %vm256_vm0, %v4689_v11  ;;  %4339 = vmatprep.subr.mxu0 %v4686_v0 }
  0xb5   : > { %4325 = vmatpush3.msra.mxu1 %v2135_v7  ;;  %4326 = vmatprep.mubr.msk.f32.mxu1 %vm4687_vm1, %v4686_v0 }
  0xb6   : > { %4332 = vmatmul.mubr.f32.vlgmr.msra.gmra.mrb[26].mxu0 %v4878_v3  ;;  %4334 = vmatprep.subr.mxu1 %v4686_v0 }
  0xb7   : > { %4340 = vmatpush3.msra.mxu0 %v2133_v1  ;;  %4341 = vmatprep.mubr.msk.f32.mxu0 %vm4687_vm1, %v4686_v0 }
  0xb8   : > { %4327 = vmatmul.mubr.msk.f32.vlgmr.msra.gmra.mrb[24].mxu1 %vm256_vm0, %v4689_v11  ;;  %4349 = vmatprep.subr.mxu0 %v4686_v0 }
  0xb9   : > { %4335 = vmatpush3.msk.msra.mxu1 %vm2051_vm4, %v4689_v11  ;;  %4336 = vmatprep.mubr.msk.f32.mxu1 %vm4687_vm1, %v4686_v0 }
  0xba   : > { %4342 = vmatmul.mubr.msk.f32.vlgmr.msra.gmra.mrb[28].mxu0 %vm256_vm0, %v4689_v11  ;;  %4344 = vmatprep.subr.mxu1 %v4686_v0 }
  0xbb   : > { %4350 = vmatpush3.msra.mxu0 %v5052_v6  ;;  %4351 = vmatprep.mubr.msk.f32.mxu0 %vm4687_vm1, %v4686_v0 }
  0xbc   : > { %4337 = vmatmul.mubr.f32.vlgmr.msra.gmra.mrb[26].mxu1 %v4881_v4  ;;  %4359 = vmatprep.subr.mxu0 %v4686_v0 }
  0xbd   : > { %4345 = vmatpush3.msk.msra.mxu1 %vm2051_vm4, %v4689_v11  ;;  %4346 = vmatprep.mubr.msk.f32.mxu1 %vm4687_vm1, %v4686_v0 }
  0xbe   : > { %4352 = vmatmul.mubr.f32.vlgmr.msra.gmra.mrb[30].mxu0 %v4902_v12  ;;  %4354 = vmatprep.subr.mxu1 %v4686_v0 }
  0xbf   : > { %4360 = vmatpush3.msra.mxu0 %v2580_v8  ;;  %4361 = vmatprep.mubr.msk.f32.mxu0 %vm4687_vm1, %v4686_v0 }
  0xc0   : > { %4347 = vmatmul.mubr.msk.f32.vlgmr.msra.gmra.mrb[28].mxu1 %vm256_vm0, %v4689_v11  ;;  %4369 = vmatprep.subr.mxu0 %v4686_v0 }
  0xc1   : > { %4355 = vmatpush3.msra.mxu1 %v2583_v14  ;;  %4356 = vmatprep.mubr.msk.f32.mxu1 %vm4687_vm1, %v4686_v0 }
  0xc2   : > { %4362 = vmatmul.mubr.f32.vlgmr.msra.gmra.mrb[32].mxu0 %v4878_v3  ;;  %4364 = vmatprep.subr.mxu1 %v4686_v0 }
  0xc3   : > { %4370 = vmatpush3.msra.mxu0 %v2581_v9  ;;  %4371 = vmatprep.mubr.msk.f32.mxu0 %vm4687_vm1, %v4686_v0 }
  0xc4   : > { %4357 = vmatmul.mubr.msk.f32.vlgmr.msra.gmra.mrb[30].mxu1 %vm256_vm0, %v4689_v11  ;;  %4379 = vmatprep.subr.mxu0 %v4686_v0 }
  0xc5   : > { %4365 = vmatpush3.msra.mxu1 %v5052_v6  ;;  %4366 = vmatprep.mubr.msk.f32.mxu1 %vm4687_vm1, %v4686_v0 }
  0xc6   : > { %4372 = vmatmul.mubr.msk.f32.vlgmr.msra.gmra.mrb[34].mxu0 %vm256_vm0, %v4689_v11  ;;  %4374 = vmatprep.subr.mxu1 %v4686_v0 }
  0xc7   : > { %4380 = vmatpush3.msk.msra.mxu0 %vm2948_vm5, %v4689_v11  ;;  %4381 = vmatprep.mubr.msk.f32.mxu0 %vm4687_vm1, %v4686_v0 }
  0xc8   : > { %4367 = vmatmul.mubr.f32.vlgmr.msra.gmra.mrb[32].mxu1 %v4881_v4  ;;  %4389 = vmatprep.subr.mxu0 %v4686_v0 }
  0xc9   : > { %4375 = vmatpush3.msra.mxu1 %v5052_v6  ;;  %4376 = vmatprep.mubr.msk.f32.mxu1 %vm4687_vm1, %v4686_v0 }
  0xca   : > { %4382 = vmatmul.mubr.f32.vlgmr.msra.gmra.mrb[36].mxu0 %v4902_v12  ;;  %4384 = vmatprep.subr.mxu1 %v4686_v0 }
  0xcb   : > { %4390 = vmatpush3.msra.mxu0 %v3029_v15  ;;  %4391 = vmatprep.mubr.msk.f32.mxu0 %vm4687_vm1, %v4686_v0 }
  0xcc   : > { %4377 = vmatmul.mubr.msk.f32.vlgmr.msra.gmra.mrb[34].mxu1 %vm256_vm0, %v4689_v11  ;;  %4399 = vmatprep.subr.mxu0 %v4686_v0 }
  0xcd   : > { %4385 = vmatpush3.msra.mxu1 %v3032_v19  ;;  %4386 = vmatprep.mubr.msk.f32.mxu1 %vm4687_vm1, %v4686_v0 }
  0xce   : > { %4392 = vmatmul.mubr.f32.vlgmr.msra.gmra.mrb[38].mxu0 %v4878_v3  ;;  %4394 = vmatprep.subr.mxu1 %v4686_v0 }
  0xcf   : > { %4400 = vmatpush3.msra.mxu0 %v3030_v16  ;;  %4401 = vmatprep.mubr.msk.f32.mxu0 %vm4687_vm1, %v4686_v0  ;;  %v3848_v16 = vld [vmem:[#allocation2 + $0x1] sm:$0x1] }
  0xd0   : > { %4387 = vmatmul.mubr.msk.f32.vlgmr.msra.gmra.mrb[36].mxu1 %vm256_vm0, %v4689_v11  ;;  %4409 = vmatprep.subr.mxu0 %v4686_v0 }
  0xd1   : > { %4395 = vmatpush3.msk.msra.mxu1 %vm2948_vm5, %v4689_v11  ;;  %4396 = vmatprep.mubr.msk.f32.mxu1 %vm4687_vm1, %v4686_v0 }
  0xd2   : > { %4402 = vmatmul.mubr.msk.f32.vlgmr.msra.gmra.mrb[40].mxu0 %vm256_vm0, %v4689_v11  ;;  %4404 = vmatprep.subr.mxu1 %v4686_v0 }
  0xd3   : > { %4410 = vmatpush3.msra.mxu0 %v3400_v18  ;;  %4411 = vmatprep.mubr.msk.f32.mxu0 %vm4687_vm1, %v4686_v0 }
  0xd4   : > { %4397 = vmatmul.mubr.f32.vlgmr.msra.gmra.mrb[38].mxu1 %v4881_v4  ;;  %4419 = vmatprep.subr.mxu0 %v4686_v0 }
  0xd5   : > { %4405 = vmatpush3.msk.msra.mxu1 %vm2948_vm5, %v4689_v11  ;;  %4406 = vmatprep.mubr.msk.f32.mxu1 %vm4687_vm1, %v4686_v0 }
  0xd6   : > { %4412 = vmatmul.mubr.f32.vlgmr.msra.gmra.mrb[42].mxu0 %v4902_v12  ;;  %4414 = vmatprep.subr.mxu1 %v4686_v0 }
  0xd7   : > { %4420 = vmatpush3.msra.mxu0 %v3477_v20  ;;  %4421 = vmatprep.mubr.msk.f32.mxu0 %vm4687_vm1, %v4686_v0 }
  0xd8   : > { %4407 = vmatmul.mubr.msk.f32.vlgmr.msra.gmra.mrb[40].mxu1 %vm256_vm0, %v4689_v11  ;;  %4429 = vmatprep.subr.mxu0 %v4686_v0 }
  0xd9   : > { %4415 = vmatpush3.msra.mxu1 %v3480_v23  ;;  %4416 = vmatprep.mubr.msk.f32.mxu1 %vm4687_vm1, %v4686_v0 }
  0xda   : > { %4422 = vmatmul.mubr.f32.vlgmr.msra.gmra.mrb[44].mxu0 %v4878_v3  ;;  %4424 = vmatprep.subr.mxu1 %v4686_v0 }
  0xdb   : > { %4430 = vmatpush3.msra.mxu0 %v3478_v21  ;;  %4431 = vmatprep.mubr.msk.f32.mxu0 %vm4687_vm1, %v4686_v0 }
  0xdc   : > { %4417 = vmatmul.mubr.msk.f32.vlgmr.msra.gmra.mrb[42].mxu1 %vm256_vm0, %v4689_v11 }
  0xdd   : > { %4425 = vmatpush3.msra.mxu1 %v3400_v18  ;;  %4426 = vmatprep.mubr.msk.f32.mxu1 %vm4687_vm1, %v4686_v0 }
  0xde   : > { %4432 = vmatmul.mubr.msk.f32.vlgmr.msra.gmra.mrb[46].mxu0 %vm256_vm0, %v4689_v11  ;;  %4434 = vmatprep.subr.mxu1 %v4686_v0 }
  0xe0   : > { %4427 = vmatmul.mubr.f32.vlgmr.msra.gmra.mrb[44].mxu1 %v4881_v4 }
  0xe1   : > { %4435 = vmatpush3.msra.mxu1 %v3400_v18  ;;  %4436 = vmatprep.mubr.msk.f32.mxu1 %vm4687_vm1, %v4686_v0 }
  0xe4   : > { %4437 = vmatmul.mubr.msk.f32.vlgmr.msra.gmra.mrb[46].mxu1 %vm256_vm0, %v4689_v11 }
 0x136   : > { %v332_v3 = vpop.f32.mrb[0].mxu0 }
 0x137   : > { %v4203_v5 = vpop.f32.mrb[1].mxu0 }
 0x139   : > { %v408_v25 = vpop.f32.mrb[0].mxu1 }
 0x13a   : > { %v482_v12 = vpop.f32.mrb[2].mxu0  ;;  %v409_v26 = vadd.f32 %v408_v25, %v332_v3  ;;  %v4208_v27 = vpop.f32.mrb[1].mxu1 }
 0x13b   : > { %v4213_v24 = vpop.f32.mrb[3].mxu0 }
 0x13c   : > { %v483_v29 = vadd.f32 %v482_v12, %v409_v26 }
 0x13d   : > { %v556_v31 = vpop.f32.mrb[2].mxu1 }
 0x13e   : > { %v630_v28 = vpop.f32.mrb[4].mxu0  ;;  %v557_v32 = vadd.f32 %v556_v31, %v483_v29  ;;  %v4218_v4 = vpop.f32.mrb[3].mxu1 }
 0x13f   : > { %v4223_v30 = vpop.f32.mrb[5].mxu0 }
 0x140   : > { %v631_v33 = vadd.f32 %v630_v28, %v557_v32  ;;  %v3860_v32 = vld [vmem:[#allocation2 + $0x5] sm:$0x1] }
 0x141   : > { %v702_v34 = vpop.f32.mrb[4].mxu1 }
 0x142   : > { %v703_v36 = vadd.f32 %v702_v34, %v631_v33  ;;  %v4228_v37 = vpop.f32.mrb[5].mxu1 }
 0x144   : > { %v3846_v38 = vadd.f32 %v3845_v35, %v703_v36 }
 0x146   : > { %3847 = vst [vmem:[#allocation2] sm:$0x1] %v3846_v38 }
 0x15f   : > { %v780_v11 = vpop.f32.mrb[6].mxu0 }
 0x160   : > { %v4233_v39 = vpop.f32.mrb[7].mxu0 }
 0x163   : > { %v930_v40 = vpop.f32.mrb[8].mxu0 }
 0x164   : > { %v4243_v41 = vpop.f32.mrb[9].mxu0 }
 0x167   : > { %v856_v42 = vpop.f32.mrb[6].mxu1 }
 0x168   : > { %v857_v43 = vadd.f32 %v856_v42, %v780_v11  ;;  %v4238_v44 = vpop.f32.mrb[7].mxu1 }
 0x169   : > { %v1078_v45 = vpop.f32.mrb[10].mxu0 }
 0x16a   : > { %v931_v46 = vadd.f32 %v930_v40, %v857_v43  ;;  %v4253_v47 = vpop.f32.mrb[11].mxu0 }
 0x16b   : > { %v1004_v48 = vpop.f32.mrb[8].mxu1 }
 0x16c   : > { %v1005_v49 = vadd.f32 %v1004_v48, %v931_v46  ;;  %v4248_v50 = vpop.f32.mrb[9].mxu1 }
 0x16d   : > { %v1229_v51 = vpop.f32.mrb[12].mxu0 }
 0x16e   : > { %v1079_v52 = vadd.f32 %v1078_v45, %v1005_v49  ;;  %v4263_v53 = vpop.f32.mrb[13].mxu0  ;;  %v3851_v49 = vld [vmem:[#allocation2 + $0x2] sm:$0x1] }
 0x16f   : > { %v1150_v54 = vpop.f32.mrb[10].mxu1 }
 0x170   : > { %v1151_v56 = vadd.f32 %v1150_v54, %v1079_v52  ;;  %v4258_v57 = vpop.f32.mrb[11].mxu1 }
 0x171   : > { %v1379_v58 = vpop.f32.mrb[14].mxu0 }
 0x172   : > { %v3858_v59 = vadd.f32 %v3857_v55, %v1151_v56  ;;  %v4273_v60 = vpop.f32.mrb[15].mxu0 }
 0x173   : > { %v1305_v61 = vpop.f32.mrb[12].mxu1 }
 0x174   : > { %3859 = vst [vmem:[#allocation2 + $0x4] sm:$0x1] %v3858_v59  ;;  %v1306_v62 = vadd.f32 %v1305_v61, %v1229_v51  ;;  %v4268_v63 = vpop.f32.mrb[13].mxu1 }
 0x175   : > { %v1527_v1 = vpop.f32.mrb[16].mxu0 }
 0x176   : > { %v1380_v2 = vadd.f32 %v1379_v58, %v1306_v62  ;;  %v4283_v6 = vpop.f32.mrb[17].mxu0 }
 0x177   : > { %v1453_v7 = vpop.f32.mrb[14].mxu1 }
 0x178   : > { %v1454_v8 = vadd.f32 %v1453_v7, %v1380_v2  ;;  %v4278_v9 = vpop.f32.mrb[15].mxu1 }
 0x179   : > { %v1677_v10 = vpop.f32.mrb[18].mxu0 }
 0x17a   : > { %v1528_v13 = vadd.f32 %v1527_v1, %v1454_v8  ;;  %v4293_v14 = vpop.f32.mrb[19].mxu0  ;;  %v3863_v8 = vld [vmem:[#allocation2 + $0x6] sm:$0x1] }
 0x17b   : > { %v1599_v15 = vpop.f32.mrb[16].mxu1 }
 0x17c   : > { %v1600_v17 = vadd.f32 %v1599_v15, %v1528_v13  ;;  %v4288_v18 = vpop.f32.mrb[17].mxu1 }
 0x17d   : > { %v1827_v19 = vpop.f32.mrb[20].mxu0 }
 0x17e   : > { %v3849_v20 = vadd.f32 %v3848_v16, %v1600_v17  ;;  %v4303_v21 = vpop.f32.mrb[21].mxu0 }
 0x17f   : > { %v1753_v22 = vpop.f32.mrb[18].mxu1 }
 0x180   : > { %3850 = vst [vmem:[#allocation2 + $0x1] sm:$0x1] %v3849_v20  ;;  %v1754_v23 = vadd.f32 %v1753_v22, %v1677_v10  ;;  %v4298_v3 = vpop.f32.mrb[19].mxu1 }
 0x181   : > { %v1975_v5 = vpop.f32.mrb[22].mxu0 }
 0x182   : > { %v1828_v12 = vadd.f32 %v1827_v19, %v1754_v23  ;;  %v4313_v24 = vpop.f32.mrb[23].mxu0 }
 0x183   : > { %v1901_v25 = vpop.f32.mrb[20].mxu1 }
 0x184   : > { %v1902_v26 = vadd.f32 %v1901_v25, %v1828_v12  ;;  %v4308_v27 = vpop.f32.mrb[21].mxu1 }
 0x185   : > { %v2126_v28 = vpop.f32.mrb[24].mxu0 }
 0x186   : > { %v1976_v29 = vadd.f32 %v1975_v5, %v1902_v26  ;;  %v4323_v30 = vpop.f32.mrb[25].mxu0  ;;  %v3854_v26 = vld [vmem:[#allocation2 + $0x3] sm:$0x1] }
 0x187   : > { %v2047_v31 = vpop.f32.mrb[22].mxu1 }
 0x188   : > { %v2048_v4 = vadd.f32 %v2047_v31, %v1976_v29  ;;  %v4318_v33 = vpop.f32.mrb[23].mxu1 }
 0x189   : > { %v2276_v34 = vpop.f32.mrb[26].mxu0 }
 0x18a   : > { %v3861_v35 = vadd.f32 %v3860_v32, %v2048_v4  ;;  %v4333_v36 = vpop.f32.mrb[27].mxu0 }
 0x18b   : > { %v2202_v37 = vpop.f32.mrb[24].mxu1 }
 0x18c   : > { %3862 = vst [vmem:[#allocation2 + $0x5] sm:$0x1] %v3861_v35  ;;  %v2203_v38 = vadd.f32 %v2202_v37, %v2126_v28  ;;  %v4328_v11 = vpop.f32.mrb[25].mxu1 }
 0x18d   : > { %v2424_v39 = vpop.f32.mrb[28].mxu0 }
 0x18e   : > { %v2277_v40 = vadd.f32 %v2276_v34, %v2203_v38  ;;  %v4343_v41 = vpop.f32.mrb[29].mxu0 }
 0x18f   : > { %v2350_v42 = vpop.f32.mrb[26].mxu1  ;;  %v3866_v41 = vld [vmem:[#allocation2 + $0x7] sm:$0x1] }
 0x190   : > { %v2351_v43 = vadd.f32 %v2350_v42, %v2277_v40  ;;  %v4338_v44 = vpop.f32.mrb[27].mxu1 }
 0x191   : > { %v2574_v45 = vpop.f32.mrb[30].mxu0 }
 0x192   : > { %v2425_v46 = vadd.f32 %v2424_v39, %v2351_v43  ;;  %v4353_v47 = vpop.f32.mrb[31].mxu0 }
 0x193   : > { %v2496_v48 = vpop.f32.mrb[28].mxu1 }
 0x194   : > { %v2497_v50 = vadd.f32 %v2496_v48, %v2425_v46  ;;  %v4348_v51 = vpop.f32.mrb[29].mxu1 }
 0x195   : > { %v2724_v52 = vpop.f32.mrb[32].mxu0 }
 0x196   : > { %v3852_v53 = vadd.f32 %v3851_v49, %v2497_v50  ;;  %v4363_v54 = vpop.f32.mrb[33].mxu0 }
 0x197   : > { %v2650_v55 = vpop.f32.mrb[30].mxu1 }
 0x198   : > { %3853 = vst [vmem:[#allocation2 + $0x2] sm:$0x1] %v3852_v53  ;;  %v2651_v56 = vadd.f32 %v2650_v55, %v2574_v45  ;;  %v4358_v57 = vpop.f32.mrb[31].mxu1 }
 0x199   : > { %v2872_v58 = vpop.f32.mrb[34].mxu0 }
 0x19a   : > { %v2725_v59 = vadd.f32 %v2724_v52, %v2651_v56  ;;  %v4373_v60 = vpop.f32.mrb[35].mxu0 }
 0x19b   : > { %v2798_v61 = vpop.f32.mrb[32].mxu1 }
 0x19c   : > { %v2799_v62 = vadd.f32 %v2798_v61, %v2725_v59  ;;  %v4368_v63 = vpop.f32.mrb[33].mxu1 }
 0x19d   : > { %v3023_v1 = vpop.f32.mrb[36].mxu0 }
 0x19e   : > { %v2873_v2 = vadd.f32 %v2872_v58, %v2799_v62  ;;  %v4383_v6 = vpop.f32.mrb[37].mxu0 }
 0x19f   : > { %v2944_v7 = vpop.f32.mrb[34].mxu1 }
 0x1a0   : > { %v2945_v9 = vadd.f32 %v2944_v7, %v2873_v2  ;;  %v4378_v10 = vpop.f32.mrb[35].mxu1 }
 0x1a1   : > { %v3173_v13 = vpop.f32.mrb[38].mxu0 }
 0x1a2   : > { %v3864_v14 = vadd.f32 %v3863_v8, %v2945_v9  ;;  %v4393_v15 = vpop.f32.mrb[39].mxu0 }
 0x1a3   : > { %v3099_v16 = vpop.f32.mrb[36].mxu1 }
 0x1a4   : > { %3865 = vst [vmem:[#allocation2 + $0x6] sm:$0x1] %v3864_v14  ;;  %v3100_v17 = vadd.f32 %v3099_v16, %v3023_v1  ;;  %v4388_v18 = vpop.f32.mrb[37].mxu1 }
 0x1a5   : > { %v3321_v19 = vpop.f32.mrb[40].mxu0 }
 0x1a6   : > { %v3174_v20 = vadd.f32 %v3173_v13, %v3100_v17  ;;  %v4403_v21 = vpop.f32.mrb[41].mxu0 }
 0x1a7   : > { %v3247_v22 = vpop.f32.mrb[38].mxu1 }
 0x1a8   : > { %v3248_v23 = vadd.f32 %v3247_v22, %v3174_v20  ;;  %v4398_v3 = vpop.f32.mrb[39].mxu1 }
 0x1a9   : > { %v3471_v5 = vpop.f32.mrb[42].mxu0 }
 0x1aa   : > { %v3322_v12 = vadd.f32 %v3321_v19, %v3248_v23  ;;  %v4413_v24 = vpop.f32.mrb[43].mxu0 }
 0x1ab   : > { %v3393_v25 = vpop.f32.mrb[40].mxu1 }
 0x1ac   : > { %v3394_v27 = vadd.f32 %v3393_v25, %v3322_v12  ;;  %v4408_v28 = vpop.f32.mrb[41].mxu1 }
 0x1ad   : > { %v3621_v29 = vpop.f32.mrb[44].mxu0 }
 0x1ae   : > { %v3855_v30 = vadd.f32 %v3854_v26, %v3394_v27  ;;  %v4423_v31 = vpop.f32.mrb[45].mxu0 }
 0x1af   : > { %v3547_v32 = vpop.f32.mrb[42].mxu1 }
 0x1b0   : > { %3856 = vst [vmem:[#allocation2 + $0x3] sm:$0x1] %v3855_v30  ;;  %v3548_v4 = vadd.f32 %v3547_v32, %v3471_v5  ;;  %v4418_v33 = vpop.f32.mrb[43].mxu1 }
 0x1b1   : > { %v3769_v34 = vpop.f32.mrb[46].mxu0 }
 0x1b2   : > { %v3622_v35 = vadd.f32 %v3621_v29, %v3548_v4  ;;  %v4433_v36 = vpop.f32.mrb[47].mxu0 }
 0x1b3   : > { %v3695_v37 = vpop.f32.mrb[44].mxu1 }
 0x1b4   : > { %v3696_v38 = vadd.f32 %v3695_v37, %v3622_v35  ;;  %v4428_v11 = vpop.f32.mrb[45].mxu1 }
 0x1b6   : > { %v3770_v39 = vadd.f32 %v3769_v34, %v3696_v38 }
 0x1b7   : > { %v3841_v40 = vpop.f32.mrb[46].mxu1 }
 0x1b8   : > { %v3842_v42 = vadd.f32 %v3841_v40, %v3770_v39  ;;  %v4438_v43 = vpop.f32.mrb[47].mxu1 }
 0x1ba   : > { %v3867_v44 = vadd.f32 %v3866_v41, %v3842_v42 }
 0x1bc   : > { %3868 = vst [vmem:[#allocation2 + $0x7] sm:$0x1] %v3867_v44 }
 0x1c3   : > { %v3872_v45 = vld [vmem:[#allocation2] sm:$0xff] }
 0x1c4   : > { %3873 = vadd.xlane.f32.xlu0 %v3872_v45 }
 0x251   : > { %v3874_v46 = vpop.xlane.xlu0 %3873 }
 0x252   : > { %v3876_v47 = vsel %vm3875_vm6, %v3874_v46, 0.0  ;;  %v3896_v62 = vrot.slane %v3874_v46, 4 }
 0x253   : > { %3877 = vadd.xlane.f32.xlu0 %v3876_v47 }
 0x2e0   : > { %v3878_v48 = vpop.xlane.xlu0 %3877 }
 0x2e1   : > { %v3879_v49 = vrot.slane %v3878_v48, 4 }
 0x2e3   : > { %v3880_v50 = vadd.f32 %v3879_v49, %v3878_v48 }
 0x2e5   : > { %v3881_v51 = vrot.slane %v3880_v50, 2 }
 0x2e7   : > { %v3882_v52 = vadd.f32 %v3881_v51, %v3880_v50 }
 0x2e9   : > { %v3883_v53 = vrot.slane %v3882_v52, 1 }
 0x2eb   : > { %v3884_v54 = vadd.f32 %v3883_v53, %v3882_v52 }
 0x2ed   : > { %4439 = vpush %v3884_v54 }
 0x31e   : > { %s4440_s21 = spop %4439 }
 0x31f   : > { %v3886_v55 = vstv %s4440_s21 }
 0x320   : > { %4530 = vrcp.f32 %v3886_v55 }
 0x32a   : > { %v4531_v56 = vpop.eup %4530 }
 0x32b   : > { %v3888_v57 = vmul.f32 %v4531_v56, %v3874_v46 }
 0x32d   : > { %vm3889_vm7 = vcmp.ne.f32.partialorder %v3888_v57, 0.0  ;;  %v3892_v58 = vsub.f32 1.0, %v3888_v57 }
 0x32e   : > { %v4098_v59 = vsel %vm3889_vm7, 1.0, %v4686_v0 }
 0x32f   : > { %v3893_v60 = vmul.f32 %v4098_v59, %v3892_v58 }
 0x331   : > { %v3894_v61 = vadd.f32 1.0, %v3893_v60 }
 0x333   : > { %v3898_v63 = vmul.f32 %v3896_v62, %v3894_v61  ;;  %v3910_v2 = vmul.f32 %v3894_v61, %v3874_v46 }
 0x335   : > { %v3899_v1 = vsel %vm3875_vm6, %v3898_v63, 0.0  ;;  %v3911_v6 = vsel %vm3875_vm6, %v3910_v2, 0.0 }
 0x336   : > { %3900 = vadd.xlane.f32.xlu1 %v3899_v1 }
 0x33a   : > { %3912 = vadd.xlane.f32.xlu1 %v3911_v6 }
 0x3c3   : > { %v3901_v7 = vpop.xlane.xlu1 %3900 }
 0x3c4   : > { %v3902_v8 = vrot.slane %v3901_v7, 4 }
 0x3c6   : > { %v3903_v9 = vadd.f32 %v3902_v8, %v3901_v7 }
 0x3c7   : > { %v3913_v10 = vpop.xlane.xlu1 %3912 }
 0x3c8   : > { %v3904_v13 = vrot.slane %v3903_v9, 2  ;;  %v3914_v14 = vrot.slane %v3913_v10, 4 }
 0x3ca   : > { %v3915_v15 = vadd.f32 %v3914_v14, %v3913_v10  ;;  %v3905_v0 = vadd.f32 %v3904_v13, %v3903_v9 }
 0x3cc   : > { %v3916_v16 = vrot.slane %v3915_v15, 2  ;;  %v3906_v17 = vrot.slane %v3905_v0, 1 }
 0x3ce   : > { %v3917_v18 = vadd.f32 %v3916_v16, %v3915_v15  ;;  %v3907_v19 = vadd.f32 %v3906_v17, %v3905_v0 }
 0x3d0   : > { %4441 = vpush %v3907_v19  ;;  %v3918_v20 = vrot.slane %v3917_v18, 1 }
 0x3d2   : > { %v3919_v21 = vadd.f32 %v3918_v20, %v3917_v18 }
 0x3d4   : > { %4443 = vpush %v3919_v21 }
 0x401   : > { %s4442_s26 = spop %4441 }
 0x402   : > { %s3909_s28 = ssub.f32 0.0, %s4442_s26 }
 0x405   : > { %s4444_s30 = spop %4443 }
 0x406   : > { %v3921_v22 = vstv %s4444_s30 }
 0x407   : > { %4532 = vrcp.f32 %v3921_v22 }
 0x411   : > { %v4533_v23 = vpop.eup %4532 }
 0x412   : > { %4445 = vpush %v4533_v23 }
 0x443   : > { %s4446_s25 = spop %4445 }
 0x444   : > { %s3924_s7 = smul.f32 %s4446_s25, %s3909_s28 }
 0x446   : > { %v3925_v3 = vstv %s3924_s7 }
 0x447   : > { %3926 = vst [vmem:[%s215_s29] sm:$0x1] %v3925_v3 }
 0x448   : > { %4607 = shalt.err (!%p4604_p9)
}
 0x449   : > { %s4608_s18 = scalar_lea.hbm %s5207_s20, 16  ;;  %s4612_s26 = scalar_lea.hbm %s5258_s2, 32 }
 0x44a   : > { %p4609_p1 = scmp.ne.s32.totalorder %s5207_s20, %s4608_s18  ;;  %p4613_p5 = scmp.lt.u32.totalorder %s5207_s20, %s5258_s2 }
 0x44b   : > { %p4614_p13 = scmp.lt.u32.totalorder %s4612_s26, %s4608_s18  ;;  %p4616_p0 = scmp.lt.u32.totalorder %s4608_s18, %s5207_s20 }
 0x44c   : > { %p4610_p6 = pnand %p4609_p1, %p5270_p3 }
 0x44d   : > { %p4615_p8 = por %p4614_p13, %p4613_p5 }
 0x44e   : > { %p4611_p2 = pneg %p4610_p6 }
 0x44f   : > { %p4617_p11 = por %p4616_p0, %p4615_p8 }
 0x451   : > { %p4618_p4 = pnand %p4617_p11, %p4611_p2 }
 0x453   : > { %4621 = shalt.err (!%p4618_p4)
}
 0x454   : > { %4451 = dma.vmem_to_hbm [thread:$0]  (%p5270_p3), %s5209_s3, 16, %s5207_s20, %s3928_s4  }
 0x455 PF: > { %s3952_s28 = sand.u32 1, %s4660_s9   ;;  %p5271_p7 = scmp.ne.s32.totalorder %s5264_s24, 0 }
 0x456   : > { %p5272_p10 = scmp.ge.s32.totalorder %s4680_s14, 2  ;;  %s3953_s29 = scalar_lea.sflag [#allocation5], %s3952_s28 }
 0x458   : > { %p4461_p12 = pnand %p5272_p10, %p5271_p7 }
 0x45a   : > { %4655 = dma.done.wait (!%p4461_p12), %s3953_s29, 16  }
 0x45b   : > { %4657 = vsyncadd (!%p4461_p12), %s3953_s29, 4294967280  ;;  %s21_s14 = sadd.s32 1, %s4680_s14   ;;  %s5273_s9 = smov %s4664_s10 }
 0x45c   : > { %p18_p9 = scmp.ge.s32.totalorder %s21_s14, 4   ;;  %s5274_s10 = smov %s4668_s11 }
 0x45d   : > { %s5275_s11 = smov %s4762_s23  ;;  %s5276_s12 = smov %s4676_s13 }
 0x45e   : > { %s5277_s13 = smov %s5279_s17  ;;  %20 = sbr.rel (!%p18_p9) target bundleno = 8 (0x8), region = 97 }
 0x465   :  { %3957 = vsyncpa [#allocation4], 1 }
 0x466   :  { %3959 = vsyncpa [#allocation4 + $0x1], 1 }
 0x467   :  { %3960 = vsyncpa [#allocation7], 1 }
 0x468   :  { %3962 = vsyncpa [#allocation7 + $0x1], 1 }
 0x469   :  { %3963 = vsyncpa [#allocation5], 1 }
 0x46a   :  { %3965 = vsyncpa [#allocation5 + $0x1], 1 }

</bundles_post_ra>
